<compile_context>
chip_gen: v7x
topology: tpu7x:2x2x1
jax: 0.10.0
libtpu: 0.0.40
codegen_flags: <defaults>
</compile_context>

<pallas_src>
import math
import functools

import jax
import jax.numpy as jnp
from jax.experimental import pallas as pl
from jax.experimental.pallas import tpu as pltpu

# ----------------------- model hyper-parameters ----------------------------
BATCH = 2
SEQ = 8
D_MODEL = 32
N_HEAD = 4
DH = D_MODEL // N_HEAD
N_LAYERS = 2
FF_HIDDEN = 64          # feed_forward1_hidden (dim_feedforward)
VOCAB = 128             # vocab size chosen so the logits output is lane-dense
PAD_IDX = 0
LN_EPS = 1e-5
NEG_INF = -1e9          # finite stand-in for -inf key-padding mask


# ----------------------------- kernel ---------------------------------------
def _layernorm(x, g, b):
    mu = jnp.mean(x, axis=-1, keepdims=True)
    var = jnp.mean((x - mu) ** 2, axis=-1, keepdims=True)
    return (x - mu) * jax.lax.rsqrt(var + LN_EPS) * g + b


def fused_encoder_kernel(x_ref, mask_ref, w_attn_ref, bias_ref,
                         w_ff1_ref, b_ff1_ref, w_ff2_ref, wb_proj_ref,
                         out_ref, *, n_layers, n_head):
    """Whole forward (all encoder layers + vocab projection) in one program.

    Inputs (all resident in VMEM, no grid):
      x       (N, D)          flattened embedded tokens, N = B*S
      mask    (N, N)          additive attention mask
                              (block-diagonal over batches + key padding)
      w_attn  (L, 4, D, D)    per-layer [Wq, Wk, Wv, Wo], (in, out) layout
      bias    (L, 9, D)       rows: [b_q,b_k,b_v,b_o, ln1_g,ln1_b, b_ff2,
                                     ln2_g,ln2_b]
      w_ff1   (L, D, FF)      (in, out) layout
      b_ff1   (L, 1, FF)
      w_ff2   (L, FF, D)      (in, out) layout
      wb_proj (D+1, V)        vocab projection weight (rows 0..D-1) + bias
                              (last row), (in, out) layout, V = 128
    Output:
      out     (N, V)          logits (lane-dense)
    """
    x = x_ref[...]                       # (N, D)
    mask = mask_ref[...]                 # (N, N)
    n_tok, d_model = x.shape
    dh = d_model // n_head
    scale = 1.0 / math.sqrt(dh)

    for l in range(n_layers):
        wq = w_attn_ref[l, 0]            # (D, D), (in, out)
        wk = w_attn_ref[l, 1]
        wv = w_attn_ref[l, 2]
        wo = w_attn_ref[l, 3]
        biases = bias_ref[l]             # (9, D)
        b_q, b_k, b_v = biases[0:1], biases[1:2], biases[2:3]
        b_o = biases[3:4]
        g1, be1 = biases[4:5], biases[5:6]
        b_ff2 = biases[6:7]
        g2, be2 = biases[7:8], biases[8:9]

        # ---- multi-head self-attention ----
        # Full-width (N,D)@(D,D) matmuls (one MXU pass each), heads split
        # afterwards only for the score/value contractions.
        q = jnp.dot(x, wq, preferred_element_type=jnp.float32) + b_q   # (N, D)
        k = jnp.dot(x, wk, preferred_element_type=jnp.float32) + b_k
        v = jnp.dot(x, wv, preferred_element_type=jnp.float32) + b_v

        qh = q.reshape(n_tok, n_head, dh)          # (N, H, dh)
        kh = k.reshape(n_tok, n_head, dh)
        vh = v.reshape(n_tok, n_head, dh)

        s = jnp.einsum('qhe,khe->hqk', qh, kh,
                       preferred_element_type=jnp.float32) * scale     # (H,N,N)
        s = s + mask[None, :, :]
        s = s - jnp.max(s, axis=-1, keepdims=True)
        p = jnp.exp(s)
        p = p * pl.reciprocal(jnp.sum(p, axis=-1, keepdims=True), approx=True)

        o = jnp.einsum('hqk,khe->qhe', p, vh,
                       preferred_element_type=jnp.float32)             # (N,H,dh)
        o = o.reshape(n_tok, d_model)                                  # (N, D)
        attn = jnp.dot(o, wo, preferred_element_type=jnp.float32) + b_o

        # ---- residual + post-LayerNorm ----
        x1 = _layernorm(x + attn, g1, be1)

        # ---- feed-forward: relu(x W1 + b1) W2 + b2 ----
        h1 = jnp.dot(x1, w_ff1_ref[l],
                     preferred_element_type=jnp.float32) + b_ff1_ref[l]
        h1 = jnp.maximum(h1, 0.0)
        h2 = jnp.dot(h1, w_ff2_ref[l],
                     preferred_element_type=jnp.float32) + b_ff2

        x = _layernorm(x1 + h2, g2, be2)

    # ---- vocab projection (lane-dense output, V = 128) ----
    wb = wb_proj_ref[...]                           # (D+1, V)
    w_proj = wb[:d_model, :]
    b_proj = wb[d_model:d_model + 1, :]
    out_ref[...] = jnp.dot(x, w_proj,
                           preferred_element_type=jnp.float32) + b_proj


# --------------------------- pallas wrapper ---------------------------------
def fused_forward(x2d, mask, w_attn, bias, w_ff1, b_ff1, w_ff2, wb_proj):
    n_tok = x2d.shape[0]
    vocab = wb_proj.shape[1]
    vmem = pl.BlockSpec(memory_space=pltpu.MemorySpace.VMEM)
    return pl.pallas_call(
        functools.partial(fused_encoder_kernel,
                          n_layers=N_LAYERS, n_head=N_HEAD),
        out_shape=jax.ShapeDtypeStruct((n_tok, vocab), jnp.float32),
        in_specs=[vmem] * 8,
        out_specs=vmem,
    )(x2d, mask, w_attn, bias, w_ff1, b_ff1, w_ff2, wb_proj)


# ----------------------- parameter construction -----------------------------
def kaiming_uniform(key, out_f, in_f):
    bound = math.sqrt(6.0 / in_f)       # nn.init.kaiming_uniform_(a=0)-ish
    return jax.random.uniform(key, (out_f, in_f), jnp.float32, -bound, bound)


def sinusoidal_pe(seq_len, d_model):
    pos = jnp.arange(seq_len, dtype=jnp.float32)[:, None]
    div = jnp.exp(jnp.arange(0, d_model, 2, dtype=jnp.float32)
                  * (-math.log(10000.0) / d_model))
    pe = jnp.zeros((seq_len, d_model), jnp.float32)
    pe = pe.at[:, 0::2].set(jnp.sin(pos * div))
    pe = pe.at[:, 1::2].set(jnp.cos(pos * div))
    return pe


def make_params(key):
    keys = iter(jax.random.split(key, 6 * N_LAYERS + 2))
    emb = jax.random.normal(next(keys), (VOCAB, D_MODEL), jnp.float32) * 0.1

    w_attn_l, bias_l, w1_l, b1_l, w2_l = [], [], [], [], []
    zeros = jnp.zeros(D_MODEL, jnp.float32)
    ones = jnp.ones(D_MODEL, jnp.float32)
    for _ in range(N_LAYERS):
        wq = kaiming_uniform(next(keys), D_MODEL, D_MODEL)
        wk = kaiming_uniform(next(keys), D_MODEL, D_MODEL)
        wv = kaiming_uniform(next(keys), D_MODEL, D_MODEL)
        wo = kaiming_uniform(next(keys), D_MODEL, D_MODEL)
        w1 = kaiming_uniform(next(keys), FF_HIDDEN, D_MODEL)
        w2 = kaiming_uniform(next(keys), D_MODEL, FF_HIDDEN)

        # wrapper-side layout prep (free): transpose once to (in, out), stack
        w_attn_l.append(jnp.stack([wq.T, wk.T, wv.T, wo.T], axis=0))  # (4,D,D)
        # rows: b_q,b_k,b_v,b_o, ln1_g,ln1_b, b_ff2, ln2_g,ln2_b
        bias_l.append(jnp.stack([zeros, zeros, zeros, zeros,
                                 ones, zeros,
                                 zeros,
                                 ones, zeros], axis=0))               # (9,D)
        w1_l.append(w1.T)                                             # (D,FF)
        b1_l.append(jnp.zeros((1, FF_HIDDEN), jnp.float32))
        w2_l.append(w2.T)                                             # (FF,D)

    w_proj = kaiming_uniform(next(keys), VOCAB, D_MODEL)              # (V,D)
    wb_proj = jnp.concatenate(
        [w_proj.T, jnp.zeros((1, VOCAB), jnp.float32)], axis=0)       # (D+1,V)

    return dict(
        emb=emb,
        pe=sinusoidal_pe(SEQ, D_MODEL),          # hoisted, computed once
        w_attn=jnp.stack(w_attn_l),              # (L, 4, D, D)
        bias=jnp.stack(bias_l),                  # (L, 9, D)
        w_ff1=jnp.stack(w1_l),                   # (L, D, FF)
        b_ff1=jnp.stack(b1_l),                   # (L, 1, FF)
        w_ff2=jnp.stack(w2_l),                   # (L, FF, D)
        wb_proj=wb_proj,                         # (D+1, V)
    )


# ------------------------------ forward -------------------------------------
@jax.jit
def transformer_encoder_forward(enc_input, params):
    B, S = enc_input.shape
    tok = enc_input.reshape(-1)                                   # (B*S,)

    # Embeddings: token embedding * sqrt(d_model) + positional encoding.
    # TODO(synk): the exact `Embeddings` class is not defined in the source;
    # a standard scaled-embedding + sinusoidal PE is used (gather done in JAX).
    x2d = (jnp.take(params['emb'], tok, axis=0) * math.sqrt(D_MODEL)
           + jnp.tile(params['pe'], (B, 1))).astype(jnp.float32)  # (B*S, D)

    # Additive attention mask over flattened tokens:
    #  - block-diagonal over batches (so batch-flattening cannot mix batches)
    #  - key-padding mask from pad_idx (src_key_padding_mask semantics)
    batch_id = jnp.repeat(jnp.arange(B), S)
    same_batch = batch_id[:, None] == batch_id[None, :]
    key_ok = (tok != PAD_IDX)[None, :]
    mask = jnp.where(same_batch & key_ok, 0.0, NEG_INF).astype(jnp.float32)

    logits2d = fused_forward(x2d, mask, params['w_attn'], params['bias'],
                             params['w_ff1'], params['b_ff1'],
                             params['w_ff2'], params['wb_proj'])
    return logits2d.reshape(B, S, VOCAB)                          # (B, S, V)


# -------------------------------- main ---------------------------------------
if __name__ == "__main__":
    key = jax.random.PRNGKey(0)
    k_tok, k_par = jax.random.split(key)
    # token ids in [1, VOCAB); pad the tail of each sequence with PAD_IDX
    enc_input = jax.random.randint(k_tok, (BATCH, SEQ), 1, VOCAB, dtype=jnp.int32)
    enc_input = enc_input.at[:, -2:].set(PAD_IDX)

    params = make_params(k_par)
    logits = transformer_encoder_forward(enc_input, params)
    logits = jax.block_until_ready(logits)

    assert logits.shape == (BATCH, SEQ, VOCAB)
    assert bool(jnp.all(jnp.isfinite(logits)))
    print("KERNEL_OK")
</pallas_src>

<mosaic_0001>
module attributes {stable_mosaic.version = 11 : i64} {
  func.func @fused_encoder_kernel(%arg0: memref<16x32xf32, #tpu.memory_space<vmem>>, %arg1: memref<16x16xf32, #tpu.memory_space<vmem>>, %arg2: memref<2x4x32x32xf32, #tpu.memory_space<vmem>>, %arg3: memref<2x9x32xf32, #tpu.memory_space<vmem>>, %arg4: memref<2x32x64xf32, #tpu.memory_space<vmem>>, %arg5: memref<2x1x64xf32, #tpu.memory_space<vmem>>, %arg6: memref<2x64x32xf32, #tpu.memory_space<vmem>>, %arg7: memref<33x128xf32, #tpu.memory_space<vmem>>, %arg8: memref<16x128xf32, #tpu.memory_space<vmem>>) attributes {dimension_semantics = [], scalar_prefetch = 0 : i64, scratch_operands = 0 : i64, tpu.core_type = #tpu.core_type<tc>} {
    %c0 = arith.constant 0 : index
    %c0_0 = arith.constant 0 : index
    %0 = vector.load %arg0[%c0, %c0_0] : memref<16x32xf32, #tpu.memory_space<vmem>>, vector<16x32xf32>
    %c0_1 = arith.constant 0 : index
    %c0_2 = arith.constant 0 : index
    %1 = vector.load %arg1[%c0_1, %c0_2] : memref<16x16xf32, #tpu.memory_space<vmem>>, vector<16x16xf32>
    %c0_3 = arith.constant 0 : index
    %c0_4 = arith.constant 0 : index
    %c0_5 = arith.constant 0 : index
    %c0_6 = arith.constant 0 : index
    %2 = vector.load %arg2[%c0_3, %c0_4, %c0_5, %c0_6] : memref<2x4x32x32xf32, #tpu.memory_space<vmem>>, vector<1x1x32x32xf32>
    %3 = vector.shape_cast %2 : vector<1x1x32x32xf32> to vector<32x32xf32>
    %c0_7 = arith.constant 0 : index
    %c1 = arith.constant 1 : index
    %c0_8 = arith.constant 0 : index
    %c0_9 = arith.constant 0 : index
    %4 = vector.load %arg2[%c0_7, %c1, %c0_8, %c0_9] : memref<2x4x32x32xf32, #tpu.memory_space<vmem>>, vector<1x1x32x32xf32>
    %5 = vector.shape_cast %4 : vector<1x1x32x32xf32> to vector<32x32xf32>
    %c0_10 = arith.constant 0 : index
    %c2 = arith.constant 2 : index
    %c0_11 = arith.constant 0 : index
    %c0_12 = arith.constant 0 : index
    %6 = vector.load %arg2[%c0_10, %c2, %c0_11, %c0_12] : memref<2x4x32x32xf32, #tpu.memory_space<vmem>>, vector<1x1x32x32xf32>
    %7 = vector.shape_cast %6 : vector<1x1x32x32xf32> to vector<32x32xf32>
    %c0_13 = arith.constant 0 : index
    %c3 = arith.constant 3 : index
    %c0_14 = arith.constant 0 : index
    %c0_15 = arith.constant 0 : index
    %8 = vector.load %arg2[%c0_13, %c3, %c0_14, %c0_15] : memref<2x4x32x32xf32, #tpu.memory_space<vmem>>, vector<1x1x32x32xf32>
    %9 = vector.shape_cast %8 : vector<1x1x32x32xf32> to vector<32x32xf32>
    %c0_16 = arith.constant 0 : index
    %c0_17 = arith.constant 0 : index
    %c0_18 = arith.constant 0 : index
    %10 = vector.load %arg3[%c0_16, %c0_17, %c0_18] : memref<2x9x32xf32, #tpu.memory_space<vmem>>, vector<1x9x32xf32>
    %11 = vector.shape_cast %10 : vector<1x9x32xf32> to vector<9x32xf32>
    %12 = vector.extract_strided_slice %11 {offsets = [0, 0], sizes = [1, 32], strides = [1, 1]} : vector<9x32xf32> to vector<1x32xf32>
    %13 = vector.extract_strided_slice %11 {offsets = [1, 0], sizes = [1, 32], strides = [1, 1]} : vector<9x32xf32> to vector<1x32xf32>
    %14 = vector.extract_strided_slice %11 {offsets = [2, 0], sizes = [1, 32], strides = [1, 1]} : vector<9x32xf32> to vector<1x32xf32>
    %15 = vector.extract_strided_slice %11 {offsets = [3, 0], sizes = [1, 32], strides = [1, 1]} : vector<9x32xf32> to vector<1x32xf32>
    %16 = vector.extract_strided_slice %11 {offsets = [4, 0], sizes = [1, 32], strides = [1, 1]} : vector<9x32xf32> to vector<1x32xf32>
    %17 = vector.extract_strided_slice %11 {offsets = [5, 0], sizes = [1, 32], strides = [1, 1]} : vector<9x32xf32> to vector<1x32xf32>
    %18 = vector.extract_strided_slice %11 {offsets = [6, 0], sizes = [1, 32], strides = [1, 1]} : vector<9x32xf32> to vector<1x32xf32>
    %19 = vector.extract_strided_slice %11 {offsets = [7, 0], sizes = [1, 32], strides = [1, 1]} : vector<9x32xf32> to vector<1x32xf32>
    %20 = vector.extract_strided_slice %11 {offsets = [8, 0], sizes = [1, 32], strides = [1, 1]} : vector<9x32xf32> to vector<1x32xf32>
    %cst = arith.constant dense<0.000000e+00> : vector<16x32xf32>
    %21 = tpu.matmul %0, %3, %cst {dimension_numbers = #tpu.dot_dimension_numbers<[1], [0], [0], [1], [0, 0, 1, 1], [], []>} : vector<16x32xf32>, vector<32x32xf32>, vector<16x32xf32> -> vector<16x32xf32>
    %22 = vector.broadcast %12 : vector<1x32xf32> to vector<16x32xf32>
    %23 = arith.addf %21, %22 : vector<16x32xf32>
    %cst_19 = arith.constant dense<0.000000e+00> : vector<16x32xf32>
    %24 = tpu.matmul %0, %5, %cst_19 {dimension_numbers = #tpu.dot_dimension_numbers<[1], [0], [0], [1], [0, 0, 1, 1], [], []>} : vector<16x32xf32>, vector<32x32xf32>, vector<16x32xf32> -> vector<16x32xf32>
    %25 = vector.broadcast %13 : vector<1x32xf32> to vector<16x32xf32>
    %26 = arith.addf %24, %25 : vector<16x32xf32>
    %cst_20 = arith.constant dense<0.000000e+00> : vector<16x32xf32>
    %27 = tpu.matmul %0, %7, %cst_20 {dimension_numbers = #tpu.dot_dimension_numbers<[1], [0], [0], [1], [0, 0, 1, 1], [], []>} : vector<16x32xf32>, vector<32x32xf32>, vector<16x32xf32> -> vector<16x32xf32>
    %28 = vector.broadcast %14 : vector<1x32xf32> to vector<16x32xf32>
    %29 = arith.addf %27, %28 : vector<16x32xf32>
    %30 = vector.shape_cast %23 : vector<16x32xf32> to vector<16x4x8xf32>
    %31 = vector.shape_cast %26 : vector<16x32xf32> to vector<16x4x8xf32>
    %32 = vector.shape_cast %29 : vector<16x32xf32> to vector<16x4x8xf32>
    "tpu.trace_start"() <{level = 10 : i32, message = "qhe,khe->hqk"}> : () -> ()
    %cst_21 = arith.constant dense<0.000000e+00> : vector<4x16x16xf32>
    %33 = tpu.matmul %30, %31, %cst_21 {dimension_numbers = #tpu.dot_dimension_numbers<[2], [2], [0], [0], [0, 1, 0, 0, 1, 0], [1], [1]>} : vector<16x4x8xf32>, vector<16x4x8xf32>, vector<4x16x16xf32> -> vector<4x16x16xf32>
    "tpu.trace_stop"() : () -> ()
    %cst_22 = arith.constant 0.353553385 : f32
    %34 = vector.broadcast %cst_22 : f32 to vector<4x16x16xf32>
    %35 = arith.mulf %33, %34 : vector<4x16x16xf32>
    %36 = vector.shape_cast %1 : vector<16x16xf32> to vector<1x16x16xf32>
    %37 = vector.broadcast %36 : vector<1x16x16xf32> to vector<4x16x16xf32>
    %38 = arith.addf %35, %37 : vector<4x16x16xf32>
    %cst_23 = arith.constant dense<0xFF800000> : vector<4x16xf32>
    %39 = vector.multi_reduction <maximumf>, %38, %cst_23 [2] : vector<4x16x16xf32> to vector<4x16xf32>
    %40 = vector.shape_cast %39 : vector<4x16xf32> to vector<4x16x1xf32>
    %41 = vector.broadcast %40 : vector<4x16x1xf32> to vector<4x16x16xf32>
    %42 = arith.subf %38, %41 : vector<4x16x16xf32>
    %43 = math.exp %42 : vector<4x16x16xf32>
    %cst_24 = arith.constant dense<0.000000e+00> : vector<4x16xf32>
    %44 = vector.multi_reduction <add>, %43, %cst_24 [2] : vector<4x16x16xf32> to vector<4x16xf32>
    %45 = vector.shape_cast %44 : vector<4x16xf32> to vector<4x16x1xf32>
    %46 = tpu.reciprocal %45 {approx = true} : vector<4x16x1xf32> -> vector<4x16x1xf32>
    %47 = vector.broadcast %46 : vector<4x16x1xf32> to vector<4x16x16xf32>
    %48 = arith.mulf %43, %47 : vector<4x16x16xf32>
    "tpu.trace_start"() <{level = 10 : i32, message = "hqk,khe->qhe"}> : () -> ()
    %cst_25 = arith.constant dense<0.000000e+00> : vector<4x8x16xf32>
    %49 = tpu.matmul %32, %48, %cst_25 {dimension_numbers = #tpu.dot_dimension_numbers<[0], [2], [2], [1], [0, 1, 0, 2, 1, 1], [1], [0]>} : vector<16x4x8xf32>, vector<4x16x16xf32>, vector<4x8x16xf32> -> vector<4x8x16xf32>
    %50 = tpu.transpose %49, [2, 0, 1] : vector<4x8x16xf32> -> vector<16x4x8xf32>
    "tpu.trace_stop"() : () -> ()
    %51 = vector.shape_cast %50 : vector<16x4x8xf32> to vector<16x32xf32>
    %cst_26 = arith.constant dense<0.000000e+00> : vector<16x32xf32>
    %52 = tpu.matmul %51, %9, %cst_26 {dimension_numbers = #tpu.dot_dimension_numbers<[1], [0], [0], [1], [0, 0, 1, 1], [], []>} : vector<16x32xf32>, vector<32x32xf32>, vector<16x32xf32> -> vector<16x32xf32>
    %53 = vector.broadcast %15 : vector<1x32xf32> to vector<16x32xf32>
    %54 = arith.addf %52, %53 : vector<16x32xf32>
    %55 = arith.addf %0, %54 : vector<16x32xf32>
    %cst_27 = arith.constant dense<0.000000e+00> : vector<16xf32>
    %56 = vector.multi_reduction <add>, %55, %cst_27 [1] : vector<16x32xf32> to vector<16xf32>
    %57 = vector.shape_cast %56 : vector<16xf32> to vector<16x1xf32>
    %cst_28 = arith.constant 3.200000e+01 : f32
    %58 = vector.broadcast %cst_28 : f32 to vector<16x1xf32>
    %59 = arith.divf %57, %58 : vector<16x1xf32>
    %60 = vector.broadcast %59 : vector<16x1xf32> to vector<16x32xf32>
    %61 = arith.subf %55, %60 : vector<16x32xf32>
    %62 = arith.mulf %61, %61 : vector<16x32xf32>
    %cst_29 = arith.constant dense<0.000000e+00> : vector<16xf32>
    %63 = vector.multi_reduction <add>, %62, %cst_29 [1] : vector<16x32xf32> to vector<16xf32>
    %64 = vector.shape_cast %63 : vector<16xf32> to vector<16x1xf32>
    %cst_30 = arith.constant 3.200000e+01 : f32
    %65 = vector.broadcast %cst_30 : f32 to vector<16x1xf32>
    %66 = arith.divf %64, %65 : vector<16x1xf32>
    %67 = vector.broadcast %59 : vector<16x1xf32> to vector<16x32xf32>
    %68 = arith.subf %55, %67 : vector<16x32xf32>
    %cst_31 = arith.constant 9.99999974E-6 : f32
    %69 = vector.broadcast %cst_31 : f32 to vector<16x1xf32>
    %70 = arith.addf %66, %69 : vector<16x1xf32>
    %71 = math.rsqrt %70 : vector<16x1xf32>
    %72 = vector.broadcast %71 : vector<16x1xf32> to vector<16x32xf32>
    %73 = arith.mulf %68, %72 : vector<16x32xf32>
    %74 = vector.broadcast %16 : vector<1x32xf32> to vector<16x32xf32>
    %75 = arith.mulf %73, %74 : vector<16x32xf32>
    %76 = vector.broadcast %17 : vector<1x32xf32> to vector<16x32xf32>
    %77 = arith.addf %75, %76 : vector<16x32xf32>
    %c0_32 = arith.constant 0 : index
    %c0_33 = arith.constant 0 : index
    %c0_34 = arith.constant 0 : index
    %78 = vector.load %arg4[%c0_32, %c0_33, %c0_34] : memref<2x32x64xf32, #tpu.memory_space<vmem>>, vector<1x32x64xf32>
    %79 = vector.shape_cast %78 : vector<1x32x64xf32> to vector<32x64xf32>
    %cst_35 = arith.constant dense<0.000000e+00> : vector<16x64xf32>
    %80 = tpu.matmul %77, %79, %cst_35 {dimension_numbers = #tpu.dot_dimension_numbers<[1], [0], [0], [1], [0, 0, 1, 1], [], []>} : vector<16x32xf32>, vector<32x64xf32>, vector<16x64xf32> -> vector<16x64xf32>
    %c0_36 = arith.constant 0 : index
    %c0_37 = arith.constant 0 : index
    %c0_38 = arith.constant 0 : index
    %81 = vector.load %arg5[%c0_36, %c0_37, %c0_38] : memref<2x1x64xf32, #tpu.memory_space<vmem>>, vector<1x1x64xf32>
    %82 = vector.shape_cast %81 : vector<1x1x64xf32> to vector<1x64xf32>
    %83 = vector.broadcast %82 : vector<1x64xf32> to vector<16x64xf32>
    %84 = arith.addf %80, %83 : vector<16x64xf32>
    %cst_39 = arith.constant 0.000000e+00 : f32
    %85 = vector.broadcast %cst_39 : f32 to vector<16x64xf32>
    %86 = arith.maximumf %84, %85 : vector<16x64xf32>
    %c0_40 = arith.constant 0 : index
    %c0_41 = arith.constant 0 : index
    %c0_42 = arith.constant 0 : index
    %87 = vector.load %arg6[%c0_40, %c0_41, %c0_42] : memref<2x64x32xf32, #tpu.memory_space<vmem>>, vector<1x64x32xf32>
    %88 = vector.shape_cast %87 : vector<1x64x32xf32> to vector<64x32xf32>
    %cst_43 = arith.constant dense<0.000000e+00> : vector<16x32xf32>
    %89 = tpu.matmul %86, %88, %cst_43 {dimension_numbers = #tpu.dot_dimension_numbers<[1], [0], [0], [1], [0, 0, 1, 1], [], []>} : vector<16x64xf32>, vector<64x32xf32>, vector<16x32xf32> -> vector<16x32xf32>
    %90 = vector.broadcast %18 : vector<1x32xf32> to vector<16x32xf32>
    %91 = arith.addf %89, %90 : vector<16x32xf32>
    %92 = arith.addf %77, %91 : vector<16x32xf32>
    %cst_44 = arith.constant dense<0.000000e+00> : vector<16xf32>
    %93 = vector.multi_reduction <add>, %92, %cst_44 [1] : vector<16x32xf32> to vector<16xf32>
    %94 = vector.shape_cast %93 : vector<16xf32> to vector<16x1xf32>
    %cst_45 = arith.constant 3.200000e+01 : f32
    %95 = vector.broadcast %cst_45 : f32 to vector<16x1xf32>
    %96 = arith.divf %94, %95 : vector<16x1xf32>
    %97 = vector.broadcast %96 : vector<16x1xf32> to vector<16x32xf32>
    %98 = arith.subf %92, %97 : vector<16x32xf32>
    %99 = arith.mulf %98, %98 : vector<16x32xf32>
    %cst_46 = arith.constant dense<0.000000e+00> : vector<16xf32>
    %100 = vector.multi_reduction <add>, %99, %cst_46 [1] : vector<16x32xf32> to vector<16xf32>
    %101 = vector.shape_cast %100 : vector<16xf32> to vector<16x1xf32>
    %cst_47 = arith.constant 3.200000e+01 : f32
    %102 = vector.broadcast %cst_47 : f32 to vector<16x1xf32>
    %103 = arith.divf %101, %102 : vector<16x1xf32>
    %104 = vector.broadcast %96 : vector<16x1xf32> to vector<16x32xf32>
    %105 = arith.subf %92, %104 : vector<16x32xf32>
    %cst_48 = arith.constant 9.99999974E-6 : f32
    %106 = vector.broadcast %cst_48 : f32 to vector<16x1xf32>
    %107 = arith.addf %103, %106 : vector<16x1xf32>
    %108 = math.rsqrt %107 : vector<16x1xf32>
    %109 = vector.broadcast %108 : vector<16x1xf32> to vector<16x32xf32>
    %110 = arith.mulf %105, %109 : vector<16x32xf32>
    %111 = vector.broadcast %19 : vector<1x32xf32> to vector<16x32xf32>
    %112 = arith.mulf %110, %111 : vector<16x32xf32>
    %113 = vector.broadcast %20 : vector<1x32xf32> to vector<16x32xf32>
    %114 = arith.addf %112, %113 : vector<16x32xf32>
    %c1_49 = arith.constant 1 : index
    %c0_50 = arith.constant 0 : index
    %c0_51 = arith.constant 0 : index
    %c0_52 = arith.constant 0 : index
    %115 = vector.load %arg2[%c1_49, %c0_50, %c0_51, %c0_52] : memref<2x4x32x32xf32, #tpu.memory_space<vmem>>, vector<1x1x32x32xf32>
    %116 = vector.shape_cast %115 : vector<1x1x32x32xf32> to vector<32x32xf32>
    %c1_53 = arith.constant 1 : index
    %c1_54 = arith.constant 1 : index
    %c0_55 = arith.constant 0 : index
    %c0_56 = arith.constant 0 : index
    %117 = vector.load %arg2[%c1_53, %c1_54, %c0_55, %c0_56] : memref<2x4x32x32xf32, #tpu.memory_space<vmem>>, vector<1x1x32x32xf32>
    %118 = vector.shape_cast %117 : vector<1x1x32x32xf32> to vector<32x32xf32>
    %c1_57 = arith.constant 1 : index
    %c2_58 = arith.constant 2 : index
    %c0_59 = arith.constant 0 : index
    %c0_60 = arith.constant 0 : index
    %119 = vector.load %arg2[%c1_57, %c2_58, %c0_59, %c0_60] : memref<2x4x32x32xf32, #tpu.memory_space<vmem>>, vector<1x1x32x32xf32>
    %120 = vector.shape_cast %119 : vector<1x1x32x32xf32> to vector<32x32xf32>
    %c1_61 = arith.constant 1 : index
    %c3_62 = arith.constant 3 : index
    %c0_63 = arith.constant 0 : index
    %c0_64 = arith.constant 0 : index
    %121 = vector.load %arg2[%c1_61, %c3_62, %c0_63, %c0_64] : memref<2x4x32x32xf32, #tpu.memory_space<vmem>>, vector<1x1x32x32xf32>
    %122 = vector.shape_cast %121 : vector<1x1x32x32xf32> to vector<32x32xf32>
    %c1_65 = arith.constant 1 : index
    %c0_66 = arith.constant 0 : index
    %c0_67 = arith.constant 0 : index
    %123 = vector.load %arg3[%c1_65, %c0_66, %c0_67] : memref<2x9x32xf32, #tpu.memory_space<vmem>>, vector<1x9x32xf32>
    %124 = vector.shape_cast %123 : vector<1x9x32xf32> to vector<9x32xf32>
    %125 = vector.extract_strided_slice %124 {offsets = [0, 0], sizes = [1, 32], strides = [1, 1]} : vector<9x32xf32> to vector<1x32xf32>
    %126 = vector.extract_strided_slice %124 {offsets = [1, 0], sizes = [1, 32], strides = [1, 1]} : vector<9x32xf32> to vector<1x32xf32>
    %127 = vector.extract_strided_slice %124 {offsets = [2, 0], sizes = [1, 32], strides = [1, 1]} : vector<9x32xf32> to vector<1x32xf32>
    %128 = vector.extract_strided_slice %124 {offsets = [3, 0], sizes = [1, 32], strides = [1, 1]} : vector<9x32xf32> to vector<1x32xf32>
    %129 = vector.extract_strided_slice %124 {offsets = [4, 0], sizes = [1, 32], strides = [1, 1]} : vector<9x32xf32> to vector<1x32xf32>
    %130 = vector.extract_strided_slice %124 {offsets = [5, 0], sizes = [1, 32], strides = [1, 1]} : vector<9x32xf32> to vector<1x32xf32>
    %131 = vector.extract_strided_slice %124 {offsets = [6, 0], sizes = [1, 32], strides = [1, 1]} : vector<9x32xf32> to vector<1x32xf32>
    %132 = vector.extract_strided_slice %124 {offsets = [7, 0], sizes = [1, 32], strides = [1, 1]} : vector<9x32xf32> to vector<1x32xf32>
    %133 = vector.extract_strided_slice %124 {offsets = [8, 0], sizes = [1, 32], strides = [1, 1]} : vector<9x32xf32> to vector<1x32xf32>
    %cst_68 = arith.constant dense<0.000000e+00> : vector<16x32xf32>
    %134 = tpu.matmul %114, %116, %cst_68 {dimension_numbers = #tpu.dot_dimension_numbers<[1], [0], [0], [1], [0, 0, 1, 1], [], []>} : vector<16x32xf32>, vector<32x32xf32>, vector<16x32xf32> -> vector<16x32xf32>
    %135 = vector.broadcast %125 : vector<1x32xf32> to vector<16x32xf32>
    %136 = arith.addf %134, %135 : vector<16x32xf32>
    %cst_69 = arith.constant dense<0.000000e+00> : vector<16x32xf32>
    %137 = tpu.matmul %114, %118, %cst_69 {dimension_numbers = #tpu.dot_dimension_numbers<[1], [0], [0], [1], [0, 0, 1, 1], [], []>} : vector<16x32xf32>, vector<32x32xf32>, vector<16x32xf32> -> vector<16x32xf32>
    %138 = vector.broadcast %126 : vector<1x32xf32> to vector<16x32xf32>
    %139 = arith.addf %137, %138 : vector<16x32xf32>
    %cst_70 = arith.constant dense<0.000000e+00> : vector<16x32xf32>
    %140 = tpu.matmul %114, %120, %cst_70 {dimension_numbers = #tpu.dot_dimension_numbers<[1], [0], [0], [1], [0, 0, 1, 1], [], []>} : vector<16x32xf32>, vector<32x32xf32>, vector<16x32xf32> -> vector<16x32xf32>
    %141 = vector.broadcast %127 : vector<1x32xf32> to vector<16x32xf32>
    %142 = arith.addf %140, %141 : vector<16x32xf32>
    %143 = vector.shape_cast %136 : vector<16x32xf32> to vector<16x4x8xf32>
    %144 = vector.shape_cast %139 : vector<16x32xf32> to vector<16x4x8xf32>
    %145 = vector.shape_cast %142 : vector<16x32xf32> to vector<16x4x8xf32>
    "tpu.trace_start"() <{level = 10 : i32, message = "qhe,khe->hqk"}> : () -> ()
    %cst_71 = arith.constant dense<0.000000e+00> : vector<4x16x16xf32>
    %146 = tpu.matmul %143, %144, %cst_71 {dimension_numbers = #tpu.dot_dimension_numbers<[2], [2], [0], [0], [0, 1, 0, 0, 1, 0], [1], [1]>} : vector<16x4x8xf32>, vector<16x4x8xf32>, vector<4x16x16xf32> -> vector<4x16x16xf32>
    "tpu.trace_stop"() : () -> ()
    %cst_72 = arith.constant 0.353553385 : f32
    %147 = vector.broadcast %cst_72 : f32 to vector<4x16x16xf32>
    %148 = arith.mulf %146, %147 : vector<4x16x16xf32>
    %149 = vector.shape_cast %1 : vector<16x16xf32> to vector<1x16x16xf32>
    %150 = vector.broadcast %149 : vector<1x16x16xf32> to vector<4x16x16xf32>
    %151 = arith.addf %148, %150 : vector<4x16x16xf32>
    %cst_73 = arith.constant dense<0xFF800000> : vector<4x16xf32>
    %152 = vector.multi_reduction <maximumf>, %151, %cst_73 [2] : vector<4x16x16xf32> to vector<4x16xf32>
    %153 = vector.shape_cast %152 : vector<4x16xf32> to vector<4x16x1xf32>
    %154 = vector.broadcast %153 : vector<4x16x1xf32> to vector<4x16x16xf32>
    %155 = arith.subf %151, %154 : vector<4x16x16xf32>
    %156 = math.exp %155 : vector<4x16x16xf32>
    %cst_74 = arith.constant dense<0.000000e+00> : vector<4x16xf32>
    %157 = vector.multi_reduction <add>, %156, %cst_74 [2] : vector<4x16x16xf32> to vector<4x16xf32>
    %158 = vector.shape_cast %157 : vector<4x16xf32> to vector<4x16x1xf32>
    %159 = tpu.reciprocal %158 {approx = true} : vector<4x16x1xf32> -> vector<4x16x1xf32>
    %160 = vector.broadcast %159 : vector<4x16x1xf32> to vector<4x16x16xf32>
    %161 = arith.mulf %156, %160 : vector<4x16x16xf32>
    "tpu.trace_start"() <{level = 10 : i32, message = "hqk,khe->qhe"}> : () -> ()
    %cst_75 = arith.constant dense<0.000000e+00> : vector<4x8x16xf32>
    %162 = tpu.matmul %145, %161, %cst_75 {dimension_numbers = #tpu.dot_dimension_numbers<[0], [2], [2], [1], [0, 1, 0, 2, 1, 1], [1], [0]>} : vector<16x4x8xf32>, vector<4x16x16xf32>, vector<4x8x16xf32> -> vector<4x8x16xf32>
    %163 = tpu.transpose %162, [2, 0, 1] : vector<4x8x16xf32> -> vector<16x4x8xf32>
    "tpu.trace_stop"() : () -> ()
    %164 = vector.shape_cast %163 : vector<16x4x8xf32> to vector<16x32xf32>
    %cst_76 = arith.constant dense<0.000000e+00> : vector<16x32xf32>
    %165 = tpu.matmul %164, %122, %cst_76 {dimension_numbers = #tpu.dot_dimension_numbers<[1], [0], [0], [1], [0, 0, 1, 1], [], []>} : vector<16x32xf32>, vector<32x32xf32>, vector<16x32xf32> -> vector<16x32xf32>
    %166 = vector.broadcast %128 : vector<1x32xf32> to vector<16x32xf32>
    %167 = arith.addf %165, %166 : vector<16x32xf32>
    %168 = arith.addf %114, %167 : vector<16x32xf32>
    %cst_77 = arith.constant dense<0.000000e+00> : vector<16xf32>
    %169 = vector.multi_reduction <add>, %168, %cst_77 [1] : vector<16x32xf32> to vector<16xf32>
    %170 = vector.shape_cast %169 : vector<16xf32> to vector<16x1xf32>
    %cst_78 = arith.constant 3.200000e+01 : f32
    %171 = vector.broadcast %cst_78 : f32 to vector<16x1xf32>
    %172 = arith.divf %170, %171 : vector<16x1xf32>
    %173 = vector.broadcast %172 : vector<16x1xf32> to vector<16x32xf32>
    %174 = arith.subf %168, %173 : vector<16x32xf32>
    %175 = arith.mulf %174, %174 : vector<16x32xf32>
    %cst_79 = arith.constant dense<0.000000e+00> : vector<16xf32>
    %176 = vector.multi_reduction <add>, %175, %cst_79 [1] : vector<16x32xf32> to vector<16xf32>
    %177 = vector.shape_cast %176 : vector<16xf32> to vector<16x1xf32>
    %cst_80 = arith.constant 3.200000e+01 : f32
    %178 = vector.broadcast %cst_80 : f32 to vector<16x1xf32>
    %179 = arith.divf %177, %178 : vector<16x1xf32>
    %180 = vector.broadcast %172 : vector<16x1xf32> to vector<16x32xf32>
    %181 = arith.subf %168, %180 : vector<16x32xf32>
    %cst_81 = arith.constant 9.99999974E-6 : f32
    %182 = vector.broadcast %cst_81 : f32 to vector<16x1xf32>
    %183 = arith.addf %179, %182 : vector<16x1xf32>
    %184 = math.rsqrt %183 : vector<16x1xf32>
    %185 = vector.broadcast %184 : vector<16x1xf32> to vector<16x32xf32>
    %186 = arith.mulf %181, %185 : vector<16x32xf32>
    %187 = vector.broadcast %129 : vector<1x32xf32> to vector<16x32xf32>
    %188 = arith.mulf %186, %187 : vector<16x32xf32>
    %189 = vector.broadcast %130 : vector<1x32xf32> to vector<16x32xf32>
    %190 = arith.addf %188, %189 : vector<16x32xf32>
    %c1_82 = arith.constant 1 : index
    %c0_83 = arith.constant 0 : index
    %c0_84 = arith.constant 0 : index
    %191 = vector.load %arg4[%c1_82, %c0_83, %c0_84] : memref<2x32x64xf32, #tpu.memory_space<vmem>>, vector<1x32x64xf32>
    %192 = vector.shape_cast %191 : vector<1x32x64xf32> to vector<32x64xf32>
    %cst_85 = arith.constant dense<0.000000e+00> : vector<16x64xf32>
    %193 = tpu.matmul %190, %192, %cst_85 {dimension_numbers = #tpu.dot_dimension_numbers<[1], [0], [0], [1], [0, 0, 1, 1], [], []>} : vector<16x32xf32>, vector<32x64xf32>, vector<16x64xf32> -> vector<16x64xf32>
    %c1_86 = arith.constant 1 : index
    %c0_87 = arith.constant 0 : index
    %c0_88 = arith.constant 0 : index
    %194 = vector.load %arg5[%c1_86, %c0_87, %c0_88] : memref<2x1x64xf32, #tpu.memory_space<vmem>>, vector<1x1x64xf32>
    %195 = vector.shape_cast %194 : vector<1x1x64xf32> to vector<1x64xf32>
    %196 = vector.broadcast %195 : vector<1x64xf32> to vector<16x64xf32>
    %197 = arith.addf %193, %196 : vector<16x64xf32>
    %cst_89 = arith.constant 0.000000e+00 : f32
    %198 = vector.broadcast %cst_89 : f32 to vector<16x64xf32>
    %199 = arith.maximumf %197, %198 : vector<16x64xf32>
    %c1_90 = arith.constant 1 : index
    %c0_91 = arith.constant 0 : index
    %c0_92 = arith.constant 0 : index
    %200 = vector.load %arg6[%c1_90, %c0_91, %c0_92] : memref<2x64x32xf32, #tpu.memory_space<vmem>>, vector<1x64x32xf32>
    %201 = vector.shape_cast %200 : vector<1x64x32xf32> to vector<64x32xf32>
    %cst_93 = arith.constant dense<0.000000e+00> : vector<16x32xf32>
    %202 = tpu.matmul %199, %201, %cst_93 {dimension_numbers = #tpu.dot_dimension_numbers<[1], [0], [0], [1], [0, 0, 1, 1], [], []>} : vector<16x64xf32>, vector<64x32xf32>, vector<16x32xf32> -> vector<16x32xf32>
    %203 = vector.broadcast %131 : vector<1x32xf32> to vector<16x32xf32>
    %204 = arith.addf %202, %203 : vector<16x32xf32>
    %205 = arith.addf %190, %204 : vector<16x32xf32>
    %cst_94 = arith.constant dense<0.000000e+00> : vector<16xf32>
    %206 = vector.multi_reduction <add>, %205, %cst_94 [1] : vector<16x32xf32> to vector<16xf32>
    %207 = vector.shape_cast %206 : vector<16xf32> to vector<16x1xf32>
    %cst_95 = arith.constant 3.200000e+01 : f32
    %208 = vector.broadcast %cst_95 : f32 to vector<16x1xf32>
    %209 = arith.divf %207, %208 : vector<16x1xf32>
    %210 = vector.broadcast %209 : vector<16x1xf32> to vector<16x32xf32>
    %211 = arith.subf %205, %210 : vector<16x32xf32>
    %212 = arith.mulf %211, %211 : vector<16x32xf32>
    %cst_96 = arith.constant dense<0.000000e+00> : vector<16xf32>
    %213 = vector.multi_reduction <add>, %212, %cst_96 [1] : vector<16x32xf32> to vector<16xf32>
    %214 = vector.shape_cast %213 : vector<16xf32> to vector<16x1xf32>
    %cst_97 = arith.constant 3.200000e+01 : f32
    %215 = vector.broadcast %cst_97 : f32 to vector<16x1xf32>
    %216 = arith.divf %214, %215 : vector<16x1xf32>
    %217 = vector.broadcast %209 : vector<16x1xf32> to vector<16x32xf32>
    %218 = arith.subf %205, %217 : vector<16x32xf32>
    %cst_98 = arith.constant 9.99999974E-6 : f32
    %219 = vector.broadcast %cst_98 : f32 to vector<16x1xf32>
    %220 = arith.addf %216, %219 : vector<16x1xf32>
    %221 = math.rsqrt %220 : vector<16x1xf32>
    %222 = vector.broadcast %221 : vector<16x1xf32> to vector<16x32xf32>
    %223 = arith.mulf %218, %222 : vector<16x32xf32>
    %224 = vector.broadcast %132 : vector<1x32xf32> to vector<16x32xf32>
    %225 = arith.mulf %223, %224 : vector<16x32xf32>
    %226 = vector.broadcast %133 : vector<1x32xf32> to vector<16x32xf32>
    %227 = arith.addf %225, %226 : vector<16x32xf32>
    %c0_99 = arith.constant 0 : index
    %c0_100 = arith.constant 0 : index
    %228 = vector.load %arg7[%c0_99, %c0_100] : memref<33x128xf32, #tpu.memory_space<vmem>>, vector<33x128xf32>
    %229 = vector.extract_strided_slice %228 {offsets = [0, 0], sizes = [32, 128], strides = [1, 1]} : vector<33x128xf32> to vector<32x128xf32>
    %230 = vector.extract_strided_slice %228 {offsets = [32, 0], sizes = [1, 128], strides = [1, 1]} : vector<33x128xf32> to vector<1x128xf32>
    %cst_101 = arith.constant dense<0.000000e+00> : vector<16x128xf32>
    %231 = tpu.matmul %227, %229, %cst_101 {dimension_numbers = #tpu.dot_dimension_numbers<[1], [0], [0], [1], [0, 0, 1, 1], [], []>} : vector<16x32xf32>, vector<32x128xf32>, vector<16x128xf32> -> vector<16x128xf32>
    %232 = vector.broadcast %230 : vector<1x128xf32> to vector<16x128xf32>
    %233 = arith.addf %231, %232 : vector<16x128xf32>
    %c0_102 = arith.constant 0 : index
    %c0_103 = arith.constant 0 : index
    %234 = vector.load %arg8[%c0_102, %c0_103] : memref<16x128xf32, #tpu.memory_space<vmem>>, vector<16x128xf32>
    tpu.vector_store %arg8[%c0_102, %c0_103], %233 {strides = array<i32>} : memref<16x128xf32, #tpu.memory_space<vmem>>, vector<16x128xf32>,
    return
  }
}

</mosaic_0001>

<bundles_post_ra>
// kernel: transformer_encoder_forward.1
= control target key start
LH: loop header
LB: loop body
LE: loop exit
PB: predicated region body
PF: predicated region fallthrough
CT: control target
= control target key end

     0   :  { %vm59_vm0 = vcmask 261120   ;;  %s5838_s0 = inlined_call_operand.vmem [shape: f32[16,32], index: 0, kind: input, shape index: {}]   ;;  %s5839_s1 = inlined_call_operand.vmem [shape: f32[16,16], index: 1, kind: input, shape index: {}]   ;;  %s5840_s2 = inlined_call_operand.vmem [shape: f32[2,4,32,32], index: 2, kind: input, shape index: {}]   ;;  %s5841_s3 = inlined_call_operand.vmem [shape: f32[2,9,32], index: 3, kind: input, shape index: {}]   ;;  %s5842_s4 = inlined_call_operand.vmem [shape: f32[2,32,64], index: 4, kind: input, shape index: {}]   ;;  %s5843_s5 = inlined_call_operand.vmem [shape: f32[2,1,64], index: 5, kind: input, shape index: {}]   ;;  %s5844_s6 = inlined_call_operand.vmem [shape: f32[2,64,32], index: 6, kind: input, shape index: {}]   ;;  %s5845_s7 = inlined_call_operand.vmem [shape: f32[33,128], index: 7, kind: input, shape index: {}]   ;;  %s5846_s8 = inlined_call_operand.hbm [shape: f32[16,128], index: 8, kind: output, shape index: {}]  }
   0x1   :  { %v4337_v0 = vld [vmem:[%s5840_s2 + $0x20] sm:$0xff]  ;;  %v4338_v1 = vld [vmem:[%s5840_s2 + $0x28] sm:$0xff]  ;;  %v4339_v2 = vld [vmem:[%s5840_s2 + $0x30] sm:$0xff] }
   0x2   :  { %v4856_v3 = vpack.c.bf16 %v4338_v1, %v4337_v0  ;;  %v4340_v4 = vld [vmem:[%s5840_s2 + $0x38] sm:$0xff]  ;;  %v5193_v5 = vld [vmem:[%s5838_s0] sm:$0xff]  ;;  %v35_v8 = vld [vmem:[%s5840_s2 + $0x8] sm:$0xff] }
   0x3   :  { %v4860_v6 = vpack.c.bf16 %v4340_v4, %v4339_v2  ;;  %4612 = vmatprep.mubr.msk.f32.mxu1 %vm59_vm0, %v5193_v5  ;;  %v34_v7 = vld [vmem:[%s5840_s2] sm:$0xff]  ;;  %v36_v9 = vld [vmem:[%s5840_s2 + $0x10] sm:$0xff]  ;;  %4601 = vmatprep.mubr.msk.f32.mxu0 %vm59_vm0, %v5193_v5  ;;  %v37_v11 = vld [vmem:[%s5840_s2 + $0x18] sm:$0xff] }
   0x4   :  { %4857 = vmatprep.subr.bf16.mxu1 %v4856_v3  ;;  %v4848_v10 = vpack.c.bf16 %v35_v8, %v34_v7 }
   0x5   :  { %13 = vsyncpa [#allocation3], 0  ;;  %4859 = vmatpush3.bf16.msra.mxu1 %v4856_v3  ;;  %v4852_v12 = vpack.c.bf16 %v37_v11, %v36_v9  ;;  %v5214_v13 = vld [vmem:[%s5838_s0 + $0x8] sm:$0xff]  ;;  %v55_v14 = vlaneseq  ;;  %v5228_v17 = vld [vmem:[%s5841_s3] sm:$0xff]  ;;  %s5120_s0 = smov 112   ;;  %vm481_vm1 = vcmask 64512  }
   0x6   :  { %4861 = vmatprep.subr.bf16.mxu1 %v4860_v6  ;;  %4849 = vmatprep.subr.bf16.mxu0 %v4848_v10  ;;  %s5121_s27 = smov 120   ;;  %s5122_s28 = smov 104   ;;  %v4341_v35 = vld [vmem:[%s5840_s2 + $0x40] sm:$0xff]  ;;  %v4342_v36 = vld [vmem:[%s5840_s2 + $0x48] sm:$0xff]  ;;  %v4343_v37 = vld [vmem:[%s5840_s2 + $0x50] sm:$0xff]  ;;  %vm814_vm2 = vcmask 130048  }
   0x7   :  { %4851 = vmatpush3.bf16.msra.mxu0 %v4848_v10  ;;  %v5222_v15 = vshrl.u32 %v55_v14, 7  ;;  %v4864_v38 = vpack.c.bf16 %v4342_v36, %v4341_v35  ;;  %v4344_v39 = vld [vmem:[%s5840_s2 + $0x58] sm:$0xff]  ;;  %v33_v54 = vld [vmem:[%s5839_s1 + $0x8] sm:$0xff]  ;;  %v32_v57 = vld [vmem:[%s5839_s1] sm:$0xff]  ;;  %vm5124_vm3 = vmmov 0   ;;  %s5128_s29 = smov 16  }
   0x8   :  { %4853 = vmatprep.subr.bf16.mxu0 %v4852_v12  ;;  %v4868_v40 = vpack.c.bf16 %v4344_v39, %v4343_v37  ;;  %vm5340_vm4 = vmpackc.low %vm814_vm2, %vm814_vm2  ;;  %s5129_s30 = smov 8   ;;  %s5130_s9 = smov 24   ;;  %vm1775_vm5 = vcmask 195584   ;;  %vm2010_vm6 = vcmask 523264  }
   0x9   :  { %4863 = vmatpush3.bf16.msra.mxu1 %v4860_v6  ;;  %v143_v16 = vsub.s32 1, %v5222_v15  ;;  %v57_v18 = vsub.s32 0, %v5222_v15  ;;  %s5131_s14 = smov [#allocation2]  }
   0xa   :  { %s4326_s15 = sshll.u32 %s5131_s14, 4  ;;  %s4327_s15 = int_to_ptr.vmem [resolvable:$true] %s4326_s15 }
   0xb   :  { %4855 = vmatpush3.bf16.msra.mxu0 %v4852_v12  ;;  %v144_v19 = vrot.slane %v5228_v17, %v143_v16  ;;  %v58_v21 = vrot.slane %v5228_v17, %v57_v18  ;;  %p5101_p1 = scmp.lt.s32.totalorder %s4327_s15, %s4327_s15 }
   0xc   :  { %4613 = vmatmul.mubr.msk.f32.vlgmr.msra.gmra.mrb[0].mxu1 %vm59_vm0, %v5214_v13  ;;  %4865 = vmatprep.subr.bf16.mxu0 %v4864_v38 }
   0xe   :  { %4602 = vmatmul.mubr.msk.f32.vlgmr.msra.gmra.mrb[0].mxu0 %vm59_vm0, %v5214_v13 }
   0xf   :  { %4623 = vmatprep.mubr.msk.f32.mxu0 %vm59_vm0, %v5193_v5  ;;  %4867 = vmatpush3.bf16.msra.mxu0 %v4864_v38 }
  0x10   :  { %4869 = vmatprep.subr.bf16.mxu0 %v4868_v40 }
  0x13   :  { %4871 = vmatpush3.bf16.msra.mxu0 %v4868_v40 }
  0x16   :  { %4624 = vmatmul.mubr.msk.f32.vlgmr.msra.gmra.mrb[2].mxu0 %vm59_vm0, %v5214_v13 }
  0xdf   :  { %v4614_v20 = vpop.f32.mrb[0].mxu1 }
  0xe0   :  { %v217_v22 = vadd.f32 %v4614_v20, %v144_v19  ;;  %v211_v23 = vpop.f32.mrb[1].mxu1 }
  0xe1   :  { %v212_v24 = vadd.f32 %v211_v23, %v144_v19  ;;  %v4603_v25 = vpop.f32.mrb[0].mxu0 }
  0xe2   :  { %323 = vrot.lane.b32.xlu1 %v217_v22, %s5120_s0  ;;  %v132_v26 = vpop.f32.mrb[1].mxu0  ;;  %v138_v28 = vadd.f32 %v4603_v25, %v58_v21 }
  0xe3   :  { %315 = vrot.lane.b32.xlu0 %v212_v24, %s5121_s27  ;;  %v133_v27 = vadd.f32 %v132_v26, %v58_v21 }
  0xe5   :  { %4628 = vmatprep.mubr.msk.f32.mxu1 %vm481_vm1, %v133_v27 }
  0xe6   :  { %329 = vrot.lane.b32.xlu1 %v217_v22, %s5122_s28 }
  0xe7   :  { %317 = vrot.lane.b32.xlu0 %v217_v22, %s5121_s27 }
  0xe9   :  { %v4625_v51 = vpop.f32.mrb[2].mxu0 }
  0xea   :  { %321 = vrot.lane.b32.xlu1 %v212_v24, %s5120_s0  ;;  %v290_v52 = vpop.f32.mrb[3].mxu0 }
  0xeb   :  { %327 = vrot.lane.b32.xlu0 %v212_v24, %s5122_s28 }
  0xee   :  { %303 = vrot.lane.b32.xlu1 %v138_v28, %s5121_s27 }
  0xef   :  { %301 = vrot.lane.b32.xlu0 %v133_v27, %s5121_s27 }
  0xf2   :  { %307 = vrot.lane.b32.xlu1 %v138_v28, %s5120_s0 }
  0xf3   :  { %305 = vrot.lane.b32.xlu0 %v133_v27, %s5120_s0 }
  0xf6   :  { %311 = vrot.lane.b32.xlu1 %v138_v28, %s5122_s28 }
  0xf7   :  { %309 = vrot.lane.b32.xlu0 %v133_v27, %s5122_s28 }
 0x115   :  { %353 = vxpose.xlu0.b32.start [1/2] (short) (narrow) %v212_v24, 8 }
 0x119   :  { %354 = vxpose.xlu0.b32.end [2/2] (short) (narrow) %v217_v22, 8 }
 0x154   :  { %v324_v29 = vpop.permute.xlu1 %323 }
 0x155   :  { %v316_v30 = vpop.permute.xlu0 %315 }
 0x156   :  { %385 = vxpose.xlu1.b32.start [1/2] (short) (narrow) %v316_v30, 8 }
 0x158   :  { %v330_v31 = vpop.permute.xlu1 %329 }
 0x159   :  { %v318_v32 = vpop.permute.xlu0 %317 }
 0x15a   :  { %386 = vxpose.xlu1.b32.end [2/2] (short) (narrow) %v318_v32, 8 }
 0x15c   :  { %v322_v33 = vpop.permute.xlu1 %321 }
 0x15d   :  { %417 = vxpose.xlu0.b32.start [1/2] (short) (narrow) %v322_v33, 8  ;;  %v328_v34 = vpop.permute.xlu0 %327 }
 0x160   :  { %v304_v45 = vpop.permute.xlu1 %303 }
 0x161   :  { %418 = vxpose.xlu0.b32.end [2/2] (short) (narrow) %v324_v29, 8  ;;  %v302_v41 = vpop.permute.xlu0 %301  ;;  %v222_v29 = vsub.s32 2, %v5222_v15 }
 0x163   :  { %v223_v30 = vrot.slane %v5228_v17, %v222_v29 }
 0x164   :  { %v308_v46 = vpop.permute.xlu1 %307 }
 0x165   :  { %449 = vxpose.xlu0.b32.start [1/2] (short) (narrow) %v328_v34, 8  ;;  %v306_v42 = vpop.permute.xlu0 %305  ;;  %v5291_v32 = vadd.f32 %v4625_v51, %v223_v30 }
 0x168   :  { %v312_v47 = vpop.permute.xlu1 %311 }
 0x169   :  { %450 = vxpose.xlu0.b32.end [2/2] (short) (narrow) %v330_v31, 8  ;;  %v310_v43 = vpop.permute.xlu0 %309  ;;  %v5289_v31 = vadd.f32 %v290_v52, %v223_v30 }
 0x195   :  { %v369_v44 = vpop.trf.xlu0 }
 0x196   :  { %4626 = vmatprep.subr.mxu1 %v369_v44 }
 0x197   :  { %4627 = vmatpush3.msra.mxu1 %v369_v44 }
 0x198   :  { %4629 = vmatmul.mubr.msk.f32.vlgmr.msra.gmra.mrb[2].mxu1 %vm481_vm1, %v138_v28 }
 0x199   :  { %4633 = vmatprep.mubr.msk.f32.mxu1 %vm481_vm1, %v302_v41 }
 0x1d6   :  { %v401_v48 = vpop.trf.xlu1 }
 0x1d7   :  { %4631 = vmatprep.subr.mxu1 %v401_v48 }
 0x1d8   :  { %4632 = vmatpush3.msra.mxu1 %v401_v48 }
 0x1d9   :  { %4634 = vmatmul.mubr.msk.f32.vlgmr.msra.gmra.mrb[4].mxu1 %vm481_vm1, %v304_v45 }
 0x1da   :  { %4638 = vmatprep.mubr.msk.f32.mxu1 %vm481_vm1, %v306_v42 }
 0x1dd   :  { %v433_v49 = vpop.trf.xlu0 }
 0x1de   :  { %4636 = vmatprep.subr.mxu1 %v433_v49 }
 0x1df   :  { %4637 = vmatpush3.msra.mxu1 %v433_v49 }
 0x1e0   :  { %4639 = vmatmul.mubr.msk.f32.vlgmr.msra.gmra.mrb[6].mxu1 %vm481_vm1, %v308_v46 }
 0x1e1   :  { %4643 = vmatprep.mubr.msk.f32.mxu1 %vm481_vm1, %v310_v43  ;;  %v5123_v43 = vmov 0.0|0.0  }
 0x1e2   :  { %4872 = vmatprep.subr.bf16.mxu0 %v5123_v43 }
 0x1e5   :  { %v465_v50 = vpop.trf.xlu0 }
 0x1e6   :  { %4641 = vmatprep.subr.mxu1 %v465_v50 }
 0x1e7   :  { %4642 = vmatpush3.msra.mxu1 %v465_v50 }
 0x1e8   :  { %4644 = vmatmul.mubr.msk.f32.vlgmr.msra.gmra.mrb[8].mxu1 %vm481_vm1, %v312_v47  ;;  %4876 = vmatprep.subr.bf16.mxu1 %v5123_v43 }
 0x26b   :  { %v4630_v53 = vpop.f32.mrb[2].mxu1 }
 0x26c   :  { %v799_v55 = vmul.f32 0.35355338, %v4630_v53  ;;  %v552_v56 = vpop.f32.mrb[3].mxu1 }
 0x26d   :  { %v798_v58 = vmul.f32 0.35355338, %v552_v56 }
 0x26e   :  { %v807_v59 = vadd.f32 %v799_v55, %v33_v54 }
 0x26f   :  { %v806_v60 = vadd.f32 %v798_v58, %v32_v57 }
 0x270   :  { %v818_v61 = vsel %vm814_vm2, %v807_v59, -inf }
 0x271   :  { %819 = vmax.xlane.f32.xlu0 %v818_v61  ;;  %v815_v62 = vsel %vm814_vm2, %v806_v60, -inf }
 0x272   :  { %816 = vmax.xlane.f32.xlu1 %v815_v62 }
 0x2ac   :  { %v4635_v63 = vpop.f32.mrb[4].mxu1 }
 0x2ad   :  { %v801_v0 = vmul.f32 0.35355338, %v4635_v63  ;;  %v631_v1 = vpop.f32.mrb[5].mxu1 }
 0x2ae   :  { %v800_v2 = vmul.f32 0.35355338, %v631_v1 }
 0x2af   :  { %v809_v3 = vadd.f32 %v801_v0, %v33_v54 }
 0x2b0   :  { %v808_v6 = vadd.f32 %v800_v2, %v32_v57 }
 0x2b1   :  { %v824_v4 = vsel %vm814_vm2, %v809_v3, -inf }
 0x2b2   :  { %825 = vmax.xlane.f32.xlu1 %v824_v4  ;;  %v821_v11 = vsel %vm814_vm2, %v808_v6, -inf }
 0x2b3   :  { %v4640_v7 = vpop.f32.mrb[6].mxu1 }
 0x2b4   :  { %v803_v8 = vmul.f32 0.35355338, %v4640_v7  ;;  %v710_v9 = vpop.f32.mrb[7].mxu1 }
 0x2b5   :  { %v802_v10 = vmul.f32 0.35355338, %v710_v9 }
 0x2b6   :  { %822 = vmax.xlane.f32.xlu1 %v821_v11  ;;  %v811_v12 = vadd.f32 %v803_v8, %v33_v54  ;;  %v5125_v11 = vmov 0.0  }
 0x2b7   :  { %v810_v14 = vadd.f32 %v802_v10, %v32_v57  ;;  %4657 = vmatprep.mubr.msk.f32.mxu1 %vm5124_vm3, %v5125_v11  ;;  %4650 = vmatprep.mubr.msk.f32.mxu0 %vm5124_vm3, %v5125_v11 }
 0x2b8   :  { %v830_v19 = vsel %vm814_vm2, %v811_v12, -inf }
 0x2b9   :  { %831 = vmax.xlane.f32.xlu0 %v830_v19  ;;  %v827_v20 = vsel %vm814_vm2, %v810_v14, -inf }
 0x2ba   :  { %828 = vmax.xlane.f32.xlu1 %v827_v20 }
 0x2bb   :  { %v4645_v21 = vpop.f32.mrb[8].mxu1 }
 0x2bc   :  { %v805_v22 = vmul.f32 0.35355338, %v4645_v21  ;;  %v789_v23 = vpop.f32.mrb[9].mxu1 }
 0x2bd   :  { %v804_v24 = vmul.f32 0.35355338, %v789_v23 }
 0x2be   :  { %v813_v25 = vadd.f32 %v805_v22, %v33_v54 }
 0x2bf   :  { %v812_v26 = vadd.f32 %v804_v24, %v32_v57 }
 0x2c0   :  { %v836_v27 = vsel %vm814_vm2, %v813_v25, -inf }
 0x2c1   :  { %837 = vmax.xlane.f32.xlu0 %v836_v27  ;;  %v833_v28 = vsel %vm814_vm2, %v812_v26, -inf }
 0x2c2   :  { %834 = vmax.xlane.f32.xlu1 %v833_v28 }
 0x2d3   :  { %335 = vrot.lane.b32.xlu1 %v5289_v31, %s5121_s27 }
 0x2d7   :  { %341 = vrot.lane.b32.xlu0 %v5289_v31, %s5120_s0  ;;  %337 = vrot.lane.b32.xlu1 %v5291_v32, %s5121_s27 }
 0x2db   :  { %347 = vrot.lane.b32.xlu1 %v5289_v31, %s5122_s28 }
 0x2df   :  { %343 = vrot.lane.b32.xlu1 %v5291_v32, %s5120_s0 }
 0x2fe   :  { %v820_v33 = vpop.xlane.xlu0 %819 }
 0x2ff   :  { %v840_v34 = vsub.f32 %v807_v59, %v820_v33  ;;  %v817_v35 = vpop.xlane.xlu1 %816 }
 0x300   :  { %v839_v36 = vsub.f32 %v806_v60, %v817_v35 }
 0x301   :  { %v849_v37 = vmul.f32 1.442695, %v840_v34 }
 0x302   :  { %v847_v38 = vmul.f32 1.442695, %v839_v36 }
 0x303   :  { %5013 = vpow2.f32 %v849_v37 }
 0x304   :  { %5015 = vpow2.f32 %v847_v38 }
 0x30d   :  { %v5303_v39 = vpop.eup %5013 }
 0x30e   :  { %v866_v40 = vsel %vm814_vm2, %v5303_v39, 0.0  ;;  %v5307_v41 = vpop.eup %5015 }
 0x30f   :  { %867 = vadd.xlane.f32.xlu0 %v866_v40  ;;  %v863_v42 = vsel %vm814_vm2, %v5307_v41, 0.0 }
 0x313   :  { %864 = vadd.xlane.f32.xlu0 %v863_v42 }
 0x33f   :  { %v826_v44 = vpop.xlane.xlu1 %825 }
 0x340   :  { %v842_v45 = vsub.f32 %v809_v3, %v826_v44 }
 0x342   :  { %v853_v46 = vmul.f32 1.442695, %v842_v45 }
 0x343   :  { %v823_v47 = vpop.xlane.xlu1 %822 }
 0x344   :  { %5017 = vpow2.f32 %v853_v46  ;;  %v841_v48 = vsub.f32 %v808_v6, %v823_v47 }
 0x346   :  { %v851_v49 = vmul.f32 1.442695, %v841_v48  ;;  %v832_v50 = vpop.xlane.xlu0 %831 }
 0x347   :  { %v844_v51 = vsub.f32 %v811_v12, %v832_v50  ;;  %v829_v52 = vpop.xlane.xlu1 %828 }
 0x348   :  { %5019 = vpow2.f32 %v851_v49  ;;  %v843_v53 = vsub.f32 %v810_v14, %v829_v52 }
 0x349   :  { %v857_v54 = vmul.f32 1.442695, %v844_v51 }
 0x34a   :  { %v855_v55 = vmul.f32 1.442695, %v843_v53 }
 0x34b   :  { %5021 = vpow2.f32 %v857_v54 }
 0x34c   :  { %5023 = vpow2.f32 %v855_v55 }
 0x34e   :  { %v5313_v56 = vpop.eup %5017  ;;  %v838_v57 = vpop.xlane.xlu0 %837 }
 0x34f   :  { %v846_v58 = vsub.f32 %v813_v25, %v838_v57  ;;  %v835_v59 = vpop.xlane.xlu1 %834  ;;  %v872_v60 = vsel %vm814_vm2, %v5313_v56, 0.0 }
 0x350   :  { %v845_v61 = vsub.f32 %v812_v26, %v835_v59  ;;  %873 = vadd.xlane.f32.xlu0 %v872_v60 }
 0x351   :  { %v861_v62 = vmul.f32 1.442695, %v846_v58 }
 0x352   :  { %v5020_v63 = vpop.eup %5019  ;;  %v859_v0 = vmul.f32 1.442695, %v845_v61  ;;  %v342_v20 = vpop.permute.xlu0 %341 }
 0x353   :  { %5025 = vpow2.f32 %v861_v62  ;;  %v869_v1 = vsel %vm814_vm2, %v5020_v63, 0.0  ;;  %v336_v12 = vpop.permute.xlu1 %335 }
 0x354   :  { %870 = vadd.xlane.f32.xlu0 %v869_v1  ;;  %5027 = vpow2.f32 %v859_v0 }
 0x355   :  { %v5318_v2 = vpop.eup %5021 }
 0x356   :  { %v5320_v3 = vpop.eup %5023  ;;  %v878_v4 = vsel %vm814_vm2, %v5318_v2, 0.0 }
 0x357   :  { %v875_v6 = vsel %vm814_vm2, %v5320_v3, 0.0  ;;  %v338_v14 = vpop.permute.xlu1 %337 }
 0x358   :  { %879 = vadd.xlane.f32.xlu0 %v878_v4  ;;  %876 = vadd.xlane.f32.xlu1 %v875_v6  ;;  %v5126_v6 = vmov 1983009808  }
 0x35b   :  { %v348_v19 = vpop.permute.xlu1 %347 }
 0x35d   :  { %v5026_v7 = vpop.eup %5025 }
 0x35e   :  { %v884_v8 = vsel %vm814_vm2, %v5026_v7, 0.0  ;;  %v5028_v9 = vpop.eup %5027 }
 0x35f   :  { %885 = vadd.xlane.f32.xlu1 %v884_v8  ;;  %v881_v10 = vsel %vm814_vm2, %v5028_v9, 0.0  ;;  %v344_v21 = vpop.permute.xlu1 %343  ;;  %v5127_v8 = vmov 1934713408  }
 0x363   :  { %882 = vadd.xlane.f32.xlu1 %v881_v10 }
 0x36e   :  { %349 = vrot.lane.b32.xlu0 %v5291_v32, %s5122_s28 }
 0x38c   :  { %935 = vxpose.xlu0.b32.start [1/2] (short) (narrow) %v336_v12, 8 }
 0x390   :  { %936 = vxpose.xlu0.b32.end [2/2] (short) (narrow) %v338_v14, 8 }
 0x394   :  { %967 = vxpose.xlu0.b32.start [1/2] (short) (narrow) %v342_v20, 8 }
 0x396   :  { %903 = vxpose.xlu1.b32.start [1/2] (short) (narrow) %v5289_v31, 8 }
 0x398   :  { %968 = vxpose.xlu0.b32.end [2/2] (short) (narrow) %v344_v21, 8 }
 0x39a   :  { %904 = vxpose.xlu1.b32.end [2/2] (short) (narrow) %v5291_v32, 8 }
 0x39c   :  { %v868_v22 = vpop.xlane.xlu0 %867 }
 0x39d   :  { %5029 = vrcp.f32 %v868_v22 }
 0x39e   :  { %999 = vxpose.xlu1.b32.start [1/2] (short) (narrow) %v348_v19, 8 }
 0x3a0   :  { %v865_v23 = vpop.xlane.xlu0 %864 }
 0x3a1   :  { %5031 = vrcp.f32 %v865_v23 }
 0x3a7   :  { %v5030_v24 = vpop.eup %5029 }
 0x3a8   :  { %v896_v26 = vmul.f32 %v5030_v24, %v5303_v39 }
 0x3ab   :  { %v5032_v25 = vpop.eup %5031 }
 0x3ac   :  { %v895_v27 = vmul.f32 %v5032_v25, %v5307_v41 }
 0x3ae   :  { %v4873_v30 = vpack.c.bf16 %v896_v26, %v895_v27 }
 0x3b0   :  { %4875 = vmatpush3.bf16.xpose.msk.msra.mxu0 %vm5340_vm4, %v4873_v30 }
 0x3b1   :  { %4880 = vmatprep.subr.bf16.mxu0 %v5123_v43 }
 0x3dd   :  { %v874_v31 = vpop.xlane.xlu0 %873 }
 0x3de   :  { %5033 = vrcp.f32 %v874_v31 }
 0x3e1   :  { %v871_v32 = vpop.xlane.xlu0 %870 }
 0x3e2   :  { %5035 = vrcp.f32 %v871_v32 }
 0x3e5   :  { %v880_v33 = vpop.xlane.xlu0 %879  ;;  %v877_v39 = vpop.xlane.xlu1 %876 }
 0x3e8   :  { %v5034_v35 = vpop.eup %5033 }
 0x3e9   :  { %v350_v34 = vpop.permute.xlu0 %349  ;;  %v898_v37 = vmul.f32 %v5034_v35, %v5313_v56 }
 0x3ea   :  { %1000 = vxpose.xlu1.b32.end [2/2] (short) (narrow) %v350_v34, 8 }
 0x3ec   :  { %v5036_v36 = vpop.eup %5035  ;;  %v886_v41 = vpop.xlane.xlu1 %885 }
 0x3ed   :  { %v897_v38 = vmul.f32 %v5036_v36, %v5020_v63 }
 0x3ef   :  { %v4877_v40 = vpack.c.bf16 %v898_v37, %v897_v38 }
 0x3f0   :  { %v883_v42 = vpop.xlane.xlu1 %882 }
 0x3f1   :  { %4879 = vmatpush3.bf16.xpose.msk.msra.mxu1 %vm5340_vm4, %v4877_v40  ;;  %5037 = vrcp.f32 %v883_v42 }
 0x3f2   :  { %4884 = vmatprep.subr.bf16.mxu1 %v5123_v43  ;;  %5039 = vrcp.f32 %v886_v41 }
 0x3f3   :  { %5041 = vrcp.f32 %v880_v33 }
 0x3f4   :  { %5043 = vrcp.f32 %v877_v39 }
 0x3fb   :  { %v5038_v44 = vpop.eup %5037 }
 0x3fc   :  { %v5040_v45 = vpop.eup %5039  ;;  %v901_v46 = vmul.f32 %v5038_v44, %v5028_v9  ;;  %v1510_v9 = vunpack.c.l.s4 %v5127_v8 }
 0x3fd   :  { %v902_v47 = vmul.f32 %v5040_v45, %v5026_v7  ;;  %v5042_v50 = vpop.eup %5041  ;;  %v1478_v7 = vunpack.c.l.s4 %v5126_v6 }
 0x3fe   :  { %v5044_v51 = vpop.eup %5043  ;;  %v900_v52 = vmul.f32 %v5042_v50, %v5318_v2  ;;  %v1511_v19 = vunpack.c.0.s8 %v1510_v9 }
 0x3ff   :  { %v4885_v49 = vpack.c.bf16 %v902_v47, %v901_v46  ;;  %v899_v53 = vmul.f32 %v5044_v51, %v5320_v3  ;;  %v1479_v12 = vunpack.c.0.s8 %v1478_v7 }
 0x400   :  { %v5369_v27 = vsub.s32 %v1511_v19, %v5222_v15 }
 0x401   :  { %v4881_v55 = vpack.c.bf16 %v900_v52, %v899_v53  ;;  %v5366_v20 = vsub.s32 %v1479_v12, %v5222_v15 }
 0x40c   :  { %v951_v48 = vpop.trf.xlu0 }
 0x40d   :  { %4658 = vmatmul.mubr.msk.f32.vlgmr.msra.gmra.mrb[10].mxu1 %vm814_vm2, %v951_v48 }
 0x40e   :  { %4887 = vmatpush3.bf16.xpose.msk.msra.mxu1 %vm5340_vm4, %v4885_v49  ;;  %4671 = vmatprep.mubr.msk.f32.mxu1 %vm5124_vm3, %v5125_v11 }
 0x414   :  { %v983_v56 = vpop.trf.xlu0 }
 0x416   :  { %v919_v54 = vpop.trf.xlu1 }
 0x417   :  { %4651 = vmatmul.mubr.msk.f32.vlgmr.msra.gmra.mrb[4].mxu0 %vm814_vm2, %v919_v54 }
 0x418   :  { %4883 = vmatpush3.bf16.xpose.msk.msra.mxu0 %vm5340_vm4, %v4881_v55  ;;  %4664 = vmatprep.mubr.msk.f32.mxu0 %vm5124_vm3, %v5125_v11 }
 0x41f   :  { %4665 = vmatmul.mubr.msk.f32.vlgmr.msra.gmra.mrb[6].mxu0 %vm814_vm2, %v983_v56 }
 0x466   :  { %v1015_v57 = vpop.trf.xlu1 }
 0x467   :  { %4672 = vmatmul.mubr.msk.f32.vlgmr.msra.gmra.mrb[12].mxu1 %vm814_vm2, %v1015_v57 }
 0x4e0   :  { %v1185_v58 = vpop.f32.mrb[10].mxu1 }
 0x4e1   :  { %v4659_v59 = vpop.f32.mrb[11].mxu1  ;;  %1379 = vxpose.xlu1.b32.start.end [1/1] (short) (narrow) %v1185_v58, 16 }
 0x4ea   :  { %v1106_v60 = vpop.f32.mrb[4].mxu0 }
 0x4eb   :  { %1347 = vxpose.xlu0.b32.start.end [1/1] (short) (narrow) %v1106_v60, 16  ;;  %v4652_v61 = vpop.f32.mrb[5].mxu0 }
 0x4f2   :  { %v1264_v62 = vpop.f32.mrb[6].mxu0 }
 0x4f3   :  { %1411 = vxpose.xlu0.b32.start.end [1/1] (short) (narrow) %v1264_v62, 16  ;;  %v4666_v63 = vpop.f32.mrb[7].mxu0 }
 0x53a   :  { %v1343_v0 = vpop.f32.mrb[12].mxu1 }
 0x53b   :  { %1443 = vxpose.xlu1.b32.start.end [1/1] (short) (narrow) %v1343_v0, 16  ;;  %v4673_v1 = vpop.f32.mrb[13].mxu1 }
 0x561   :  { %v1395_v3 = vpop.trf.xlu1 }
 0x565   :  { %v1396_v10 = vpop.trf.xlu1 }
 0x56b   :  { %v1363_v2 = vpop.trf.xlu0 }
 0x56f   :  { %v1364_v4 = vpop.trf.xlu0 }
 0x573   :  { %v1427_v14 = vpop.trf.xlu0 }
 0x574   :  { %v1475_v21 = vcombine.low %v1363_v2, %v1427_v14  ;;  %v1476_v22 = vcombine.high %v1363_v2, %v1427_v14 }
 0x576   :  { %v1483_v30 = vrot.slane %v1475_v21, %v5366_v20  ;;  %v1490_v31 = vrot.slane %v1476_v22, %v5366_v20 }
 0x577   :  { %v1428_v24 = vpop.trf.xlu0 }
 0x578   :  { %v1543_v34 = vcombine.low %v1364_v4, %v1428_v24  ;;  %v1544_v35 = vcombine.high %v1364_v4, %v1428_v24  ;;  %v4345_v24 = vld [vmem:[%s5840_s2 + $0x60] sm:$0xff] }
 0x57a   :  { %v1551_v48 = vrot.slane %v1543_v34, %v5366_v20  ;;  %v1558_v49 = vrot.slane %v1544_v35, %v5366_v20  ;;  %v4348_v34 = vld [vmem:[%s5840_s2 + $0x78] sm:$0xff] }
 0x5bb   :  { %v1459_v23 = vpop.trf.xlu1 }
 0x5bc   :  { %v1491_v25 = vcombine.low %v1395_v3, %v1459_v23  ;;  %v1492_v26 = vcombine.high %v1395_v3, %v1459_v23 }
 0x5be   :  { %v1499_v32 = vrot.slane %v1491_v25, %v5366_v20  ;;  %v1506_v33 = vrot.slane %v1492_v26, %v5366_v20 }
 0x5bf   :  { %v1460_v36 = vpop.trf.xlu1 }
 0x5c0   :  { %v1507_v37 = vcombine.low %v1483_v30, %v1499_v32  ;;  %v1508_v38 = vcombine.high %v1483_v30, %v1499_v32  ;;  %v1523_v39 = vcombine.low %v1490_v31, %v1506_v33  ;;  %v1524_v40 = vcombine.high %v1490_v31, %v1506_v33  ;;  %v4346_v32 = vld [vmem:[%s5840_s2 + $0x68] sm:$0xff]  ;;  %v4347_v33 = vld [vmem:[%s5840_s2 + $0x70] sm:$0xff] }
 0x5c1   :  { %v1559_v41 = vcombine.low %v1396_v10, %v1460_v36  ;;  %v1560_v42 = vcombine.high %v1396_v10, %v1460_v36 }
 0x5c2   :  { %v1515_v44 = vrot.slane %v1507_v37, %v5369_v27  ;;  %v1522_v45 = vrot.slane %v1508_v38, %v5369_v27  ;;  %v1531_v46 = vrot.slane %v1523_v39, %v5369_v27  ;;  %v1538_v47 = vrot.slane %v1524_v40, %v5369_v27 }
 0x5c3   :  { %v1567_v50 = vrot.slane %v1559_v41, %v5366_v20  ;;  %v1574_v51 = vrot.slane %v1560_v42, %v5366_v20  ;;  %v4888_v42 = vpack.c.bf16 %v4346_v32, %v4345_v24  ;;  %v1905_v32 = vld [vmem:[%s5842_s4 + $0x8] sm:$0xff] }
 0x5c4   :  { %v1611_v52 = vcombine.low %v1515_v44, %v1522_v45  ;;  %v4375_v53 = vcombine.high %v1515_v44, %v1522_v45  ;;  %v1627_v54 = vcombine.low %v1531_v46, %v1538_v47  ;;  %v4376_v55 = vcombine.high %v1531_v46, %v1538_v47 }
 0x5c5   :  { %v1575_v56 = vcombine.low %v1551_v48, %v1567_v50  ;;  %v1576_v57 = vcombine.high %v1551_v48, %v1567_v50  ;;  %v1591_v58 = vcombine.low %v1558_v49, %v1574_v51  ;;  %v1592_v59 = vcombine.high %v1558_v49, %v1574_v51  ;;  %4889 = vmatprep.subr.bf16.mxu0 %v4888_v42 }
 0x5c6   :  { %v1618_v60 = vrot.slane %v1611_v52, %v5366_v20  ;;  %v1626_v61 = vrot.slane %v4375_v53, %v5366_v20  ;;  %v1634_v62 = vrot.slane %v1627_v54, %v5366_v20  ;;  %v1642_v63 = vrot.slane %v4376_v55, %v5366_v20  ;;  %4891 = vmatpush3.bf16.msra.mxu0 %v4888_v42 }
 0x5c7   :  { %v1583_v0 = vrot.slane %v1575_v56, %v5369_v27  ;;  %v1590_v1 = vrot.slane %v1576_v57, %v5369_v27  ;;  %v1599_v2 = vrot.slane %v1591_v58, %v5369_v27  ;;  %v1606_v3 = vrot.slane %v1592_v59, %v5369_v27 }
 0x5c8   :  { %v1644_v4 = vcombine.high %v1618_v60, %v1626_v61  ;;  %v1660_v6 = vcombine.high %v1634_v62, %v1642_v63  ;;  %v1643_v7 = vcombine.low %v1618_v60, %v1626_v61  ;;  %v1659_v8 = vcombine.low %v1634_v62, %v1642_v63 }
 0x5c9   :  { %v1679_v9 = vcombine.low %v1583_v0, %v1590_v1  ;;  %v4377_v10 = vcombine.high %v1583_v0, %v1590_v1  ;;  %v1695_v12 = vcombine.low %v1599_v2, %v1606_v3  ;;  %v4378_v14 = vcombine.high %v1599_v2, %v1606_v3 }
 0x5ca   :  { %v1658_v19 = vrot.slane %v1644_v4, %v5369_v27  ;;  %v1674_v21 = vrot.slane %v1660_v6, %v5369_v27  ;;  %v1651_v22 = vrot.slane %v1643_v7, %v5369_v27  ;;  %v1667_v23 = vrot.slane %v1659_v8, %v5369_v27 }
 0x5cb   :  { %v1686_v25 = vrot.slane %v1679_v9, %v5366_v20  ;;  %v1694_v26 = vrot.slane %v4377_v10, %v5366_v20  ;;  %v1702_v30 = vrot.slane %v1695_v12, %v5366_v20  ;;  %v1710_v31 = vrot.slane %v4378_v14, %v5366_v20 }
 0x5cc   :  { %v1677_v35 = vcombine.low %v1658_v19, %v1674_v21  ;;  %v1676_v36 = vcombine.high %v1651_v22, %v1667_v23  ;;  %v1675_v37 = vcombine.low %v1651_v22, %v1667_v23  ;;  %v4892_v44 = vpack.c.bf16 %v4348_v34, %v4347_v33  ;;  %v1906_v34 = vld [vmem:[%s5842_s4 + $0x10] sm:$0xff] }
 0x5cd   :  { %v1711_v38 = vcombine.low %v1686_v25, %v1694_v26  ;;  %v1727_v39 = vcombine.low %v1702_v30, %v1710_v31  ;;  %v1712_v40 = vcombine.high %v1686_v25, %v1694_v26  ;;  %v1728_v41 = vcombine.high %v1702_v30, %v1710_v31 }
 0x5ce   :  { %1757 = vrot.lane.b32.xlu1 %v1677_v35, %s5128_s29  ;;  %1749 = vrot.lane.b32.xlu0 %v1676_v36, %s5129_s30  ;;  %v1678_v47 = vcombine.high %v1658_v19, %v1674_v21  ;;  %v1780_v2 = vsub.s32 3, %v5222_v15  ;;  %v1907_v35 = vld [vmem:[%s5842_s4 + $0x18] sm:$0xff] }
 0x5cf   :  { %v1719_v45 = vrot.slane %v1711_v38, %v5369_v27  ;;  %v1735_v46 = vrot.slane %v1727_v39, %v5369_v27  ;;  %v1726_v49 = vrot.slane %v1712_v40, %v5369_v27  ;;  %v1742_v50 = vrot.slane %v1728_v41, %v5369_v27  ;;  %4893 = vmatprep.subr.bf16.mxu0 %v4892_v44  ;;  %v1999_v38 = vld [vmem:[%s5844_s6 + $0x8] sm:$0xff]  ;;  %v2000_v39 = vld [vmem:[%s5844_s6 + $0x10] sm:$0xff]  ;;  %v2001_v41 = vld [vmem:[%s5844_s6 + $0x18] sm:$0xff] }
 0x5d0   :  { %4895 = vmatpush3.bf16.msra.mxu0 %v4892_v44  ;;  %v1781_v3 = vrot.slane %v5228_v17, %v1780_v2  ;;  %v4900_v36 = vpack.c.bf16 %v1907_v35, %v1906_v34  ;;  %v4908_v42 = vpack.c.bf16 %v2001_v41, %v2000_v39  ;;  %v2002_v44 = vld [vmem:[%s5844_s6 + $0x20] sm:$0xff]  ;;  %v4388_v41 = vld [vmem:[%s5840_s2 + $0x88] sm:$0xff] }
 0x5d1   :  { %v1744_v48 = vcombine.high %v1719_v45, %v1735_v46  ;;  %v1743_v51 = vcombine.low %v1719_v45, %v1735_v46  ;;  %v1745_v52 = vcombine.low %v1726_v49, %v1742_v50  ;;  %v1746_v53 = vcombine.high %v1726_v49, %v1742_v50  ;;  %v2003_v45 = vld [vmem:[%s5844_s6 + $0x28] sm:$0xff] }
 0x5d2   :  { %1765 = vrot.lane.b32.xlu0 %v1678_v47, %s5130_s9  ;;  %v4912_v46 = vpack.c.bf16 %v2003_v45, %v2002_v44  ;;  %v4395_v44 = vld [vmem:[%s5840_s2 + $0xc0] sm:$0xff]  ;;  %v4396_v45 = vld [vmem:[%s5840_s2 + $0xc8] sm:$0xff] }
 0x5d3   :  { %1751 = vrot.lane.b32.xlu1 %v1744_v48, %s5129_s30 }
 0x5d7   :  { %1759 = vrot.lane.b32.xlu1 %v1745_v52, %s5128_s29 }
 0x5db   :  { %1767 = vrot.lane.b32.xlu1 %v1746_v53, %s5130_s9  ;;  %v1894_v53 = vsub.s32 4, %v5222_v15 }
 0x640   :  { %v1750_v54 = vpop.permute.xlu0 %1749  ;;  %v1758_v55 = vpop.permute.xlu1 %1757 }
 0x641   :  { %v1771_v56 = vsel %vm481_vm1, %v1675_v37, %v1750_v54  ;;  %v1998_v37 = vld [vmem:[%s5844_s6] sm:$0xff]  ;;  %v1900_v54 = vsub.s32 5, %v5222_v15 }
 0x642   :  { %v1773_v57 = vsel %vm814_vm2, %v1771_v56, %v1758_v55  ;;  %v4904_v40 = vpack.c.bf16 %v1999_v38, %v1998_v37  ;;  %v1895_v55 = vrot.slane %v5228_v17, %v1894_v53 }
 0x644   :  { %v1766_v58 = vpop.permute.xlu0 %1765  ;;  %4905 = vmatprep.subr.bf16.mxu0 %v4904_v40 }
 0x645   :  { %v1776_v59 = vsel %vm1775_vm5, %v1773_v57, %v1766_v58  ;;  %v1752_v60 = vpop.permute.xlu1 %1751  ;;  %v1901_v58 = vrot.slane %v5228_v17, %v1900_v54 }
 0x646   :  { %4682 = vmatprep.mubr.msk.f32.mxu0 %vm59_vm0, %v1776_v59  ;;  %v1772_v62 = vsel %vm481_vm1, %v1743_v51, %v1752_v60 }
 0x649   :  { %v1760_v61 = vpop.permute.xlu1 %1759 }
 0x64a   :  { %v1774_v63 = vsel %vm814_vm2, %v1772_v62, %v1760_v61 }
 0x64d   :  { %v1768_v0 = vpop.permute.xlu1 %1767 }
 0x64e   :  { %v1777_v1 = vsel %vm1775_vm5, %v1774_v63, %v1768_v0 }
 0x64f   :  { %4683 = vmatmul.mubr.msk.f32.vlgmr.msra.gmra.mrb[8].mxu0 %vm59_vm0, %v1777_v1  ;;  %v2004_v1 = vld [vmem:[%s5844_s6 + $0x30] sm:$0xff] }
 0x650   :  { %4907 = vmatpush3.bf16.msra.mxu0 %v4904_v40  ;;  %v4387_v40 = vld [vmem:[%s5840_s2 + $0x80] sm:$0xff] }
 0x651   :  { %4909 = vmatprep.subr.bf16.mxu0 %v4908_v42 }
 0x654   :  { %4911 = vmatpush3.bf16.msra.mxu0 %v4908_v42  ;;  %v4920_v42 = vpack.c.bf16 %v4388_v41, %v4387_v40 }
 0x655   :  { %4913 = vmatprep.subr.bf16.mxu0 %v4912_v46 }
 0x658   :  { %4915 = vmatpush3.bf16.msra.mxu0 %v4912_v46  ;;  %v4936_v46 = vpack.c.bf16 %v4396_v45, %v4395_v44 }
 0x722   :  { %v4684_v4 = vpop.f32.mrb[8].mxu0 }
 0x723   :  { %v1860_v6 = vadd.f32 %v4684_v4, %v1781_v3  ;;  %v1854_v7 = vpop.f32.mrb[9].mxu0 }
 0x724   :  { %v1855_v8 = vadd.f32 %v1854_v7, %v1781_v3  ;;  %v2005_v3 = vld [vmem:[%s5844_s6 + $0x38] sm:$0xff] }
 0x725   :  { %v1864_v9 = vadd.f32 %v1860_v6, %v5214_v13  ;;  %v4916_v4 = vpack.c.bf16 %v2005_v3, %v2004_v1  ;;  %v4381_v6 = vld [vmem:[%s5843_s5] ss:$0 sm:$0xff] }
 0x726   :  { %v1863_v10 = vadd.f32 %v1855_v8, %v5193_v5  ;;  %v1904_v5 = vld [vmem:[%s5842_s4] sm:$0xff] }
 0x727   :  { %v1868_v12 = vsel %vm59_vm0, %v1864_v9, 0.0  ;;  %v4896_v33 = vpack.c.bf16 %v1905_v32, %v1904_v5  ;;  %4917 = vmatprep.subr.bf16.mxu0 %v4916_v4  ;;  %v5093_v1 = vld [vmem:[%s5841_s3] sm:$0xff] }
 0x728   :  { %1869 = vadd.xlane.f32.xlu1 %v1868_v12  ;;  %v1865_v14 = vsel %vm59_vm0, %v1863_v10, 0.0  ;;  %4919 = vmatpush3.bf16.msra.mxu0 %v4916_v4 }
 0x729   :  { %1866 = vadd.xlane.f32.xlu0 %v1865_v14  ;;  %4897 = vmatprep.subr.bf16.mxu1 %v4896_v33 }
 0x72a   :  { %4899 = vmatpush3.bf16.msra.mxu1 %v4896_v33  ;;  %4937 = vmatprep.subr.bf16.mxu0 %v4936_v46 }
 0x72b   :  { %4901 = vmatprep.subr.bf16.mxu1 %v4900_v36 }
 0x72e   :  { %4903 = vmatpush3.bf16.msra.mxu1 %v4900_v36 }
 0x72f   :  { %4921 = vmatprep.subr.bf16.mxu1 %v4920_v42 }
 0x7b5   :  { %v1870_v19 = vpop.xlane.xlu1 %1869 }
 0x7b6   :  { %v1873_v21 = vmul.f32 0.03125, %v1870_v19  ;;  %v1867_v22 = vpop.xlane.xlu0 %1866  ;;  %v2008_v19 = vsub.s32 6, %v5222_v15 }
 0x7b7   :  { %v1872_v23 = vmul.f32 0.03125, %v1867_v22 }
 0x7b8   :  { %v1875_v24 = vsub.f32 %v1864_v9, %v1873_v21  ;;  %v2009_v21 = vrot.slane %v5228_v17, %v2008_v19 }
 0x7b9   :  { %v1874_v25 = vsub.f32 %v1863_v10, %v1872_v23 }
 0x7ba   :  { %v1877_v31 = vmul.f32 %v1875_v24, %v1875_v24 }
 0x7bb   :  { %v1876_v26 = vmul.f32 %v1874_v25, %v1874_v25 }
 0x7bc   :  { %v1881_v13 = vsel %vm59_vm0, %v1877_v31, 0.0 }
 0x7bd   :  { %v1878_v30 = vsel %vm59_vm0, %v1876_v26, 0.0 }
 0x7be   :  { %1879 = vadd.xlane.f32.xlu0 %v1878_v30 }
 0x7c2   :  { %1882 = vadd.xlane.f32.xlu0 %v1881_v13 }
 0x84b   :  { %v1880_v47 = vpop.xlane.xlu0 %1879 }
 0x84c   :  { %v1884_v48 = vmul.f32 0.03125, %v1880_v47  ;;  %v4389_v47 = vld [vmem:[%s5840_s2 + $0x90] sm:$0xff] }
 0x84e   :  { %v1886_v49 = vadd.f32 1e-05, %v1884_v48  ;;  %v4390_v48 = vld [vmem:[%s5840_s2 + $0x98] sm:$0xff] }
 0x84f   :  { %v1883_v50 = vpop.xlane.xlu0 %1882 }
 0x850   :  { %5045 = vrsqrt.f32 %v1886_v49  ;;  %v1885_v51 = vmul.f32 0.03125, %v1883_v50  ;;  %v4397_v49 = vld [vmem:[%s5840_s2 + $0xd0] sm:$0xff]  ;;  %v4924_v50 = vpack.c.bf16 %v4390_v48, %v4389_v47 }
 0x852   :  { %v1887_v52 = vadd.f32 1e-05, %v1885_v51  ;;  %v4398_v51 = vld [vmem:[%s5840_s2 + $0xd8] sm:$0xff] }
 0x854   :  { %5047 = vrsqrt.f32 %v1887_v52  ;;  %v4940_v52 = vpack.c.bf16 %v4398_v51, %v4397_v49 }
 0x85a   :  { %v5046_v56 = vpop.eup %5045 }
 0x85b   :  { %v1890_v57 = vmul.f32 %v5046_v56, %v1874_v25  ;;  %v4392_v56 = vld [vmem:[%s5840_s2 + $0xa8] sm:$0xff] }
 0x85d   :  { %v1896_v59 = vmul.f32 %v1895_v55, %v1890_v57 }
 0x85e   :  { %v5048_v60 = vpop.eup %5047 }
 0x85f   :  { %v1891_v61 = vmul.f32 %v5048_v60, %v1875_v24  ;;  %v1902_v62 = vadd.f32 %v1901_v58, %v1896_v59 }
 0x861   :  { %v1897_v63 = vmul.f32 %v1895_v55, %v1891_v61  ;;  %4693 = vmatprep.mubr.msk.f32.mxu1 %vm59_vm0, %v1902_v62  ;;  %v4391_v55 = vld [vmem:[%s5840_s2 + $0xa0] sm:$0xff] }
 0x862   :  { %v4928_v57 = vpack.c.bf16 %v4392_v56, %v4391_v55 }
 0x863   :  { %v1903_v0 = vadd.f32 %v1901_v58, %v1897_v63 }
 0x865   :  { %4694 = vmatmul.mubr.msk.f32.vlgmr.msra.gmra.mrb[14].mxu1 %vm59_vm0, %v1903_v0 }
 0x866   :  { %4923 = vmatpush3.bf16.msra.mxu1 %v4920_v42 }
 0x867   :  { %4925 = vmatprep.subr.bf16.mxu1 %v4924_v50 }
 0x86a   :  { %4927 = vmatpush3.bf16.msra.mxu1 %v4924_v50 }
 0x86b   :  { %4929 = vmatprep.subr.bf16.mxu1 %v4928_v57 }
 0x938   :  { %v4695_v7 = vpop.f32.mrb[14].mxu1 }
 0x939   :  { %v1993_v8 = vadd.f32 %v4695_v7, %v4381_v6  ;;  %v1987_v9 = vpop.f32.mrb[15].mxu1 }
 0x93a   :  { %v1988_v10 = vadd.f32 %v4381_v6, %v1987_v9  ;;  %v4386_v9 = vld [vmem:[%s5841_s3 + $0x8] ss:$0 sm:$0xff] }
 0x93b   :  { %v1997_v14 = vmax.f32 %v1993_v8, 0.0 }
 0x93c   :  { %v1996_v12 = vmax.f32 %v1988_v10, 0.0 }
 0x93e   :  { %4712 = vmatprep.mubr.msk.f32.mxu0 %vm2010_vm6, %v1996_v12 }
 0x93f   :  { %4713 = vmatmul.mubr.msk.f32.vlgmr.msra.gmra.mrb[10].mxu0 %vm2010_vm6, %v1997_v14  ;;  %v4393_v14 = vld [vmem:[%s5840_s2 + $0xb0] sm:$0xff] }
 0x940   :  { %4939 = vmatpush3.bf16.msra.mxu0 %v4936_v46 }
 0x941   :  { %4941 = vmatprep.subr.bf16.mxu0 %v4940_v52 }
 0x944   :  { %4943 = vmatpush3.bf16.msra.mxu0 %v4940_v52 }
 0xa12   :  { %v4714_v22 = vpop.f32.mrb[10].mxu0 }
 0xa13   :  { %v2089_v23 = vadd.f32 %v4714_v22, %v2009_v21  ;;  %v2083_v24 = vpop.f32.mrb[11].mxu0 }
 0xa14   :  { %v2084_v25 = vadd.f32 %v2083_v24, %v2009_v21  ;;  %v4394_v21 = vld [vmem:[%s5840_s2 + $0xb8] sm:$0xff] }
 0xa15   :  { %v2093_v26 = vadd.f32 %v2089_v23, %v1903_v0  ;;  %v2122_v0 = vsub.s32 7, %v5222_v15  ;;  %v4932_v24 = vpack.c.bf16 %v4394_v21, %v4393_v14  ;;  %v4456_v15 = vld [vmem:[%s5845_s7 + $0x20] ss:$0 sm:$0xff] }
 0xa16   :  { %v2092_v30 = vadd.f32 %v2084_v25, %v1902_v62  ;;  %v5562_v25 = vld [vmem:[%s5841_s3 + $0x10] sm:$0xff] }
 0xa17   :  { %v2097_v31 = vsel %vm59_vm0, %v2093_v26, 0.0  ;;  %v2123_v3 = vrot.slane %v5093_v1, %v2122_v0 }
 0xa18   :  { %2098 = vadd.xlane.f32.xlu0 %v2097_v31  ;;  %v2094_v13 = vsel %vm59_vm0, %v2092_v30, 0.0 }
 0xa19   :  { %2095 = vadd.xlane.f32.xlu1 %v2094_v13 }
 0xaa5   :  { %v2099_v5 = vpop.xlane.xlu0 %2098 }
 0xaa6   :  { %v2101_v32 = vmul.f32 0.03125, %v2099_v5  ;;  %v2096_v33 = vpop.xlane.xlu1 %2095 }
 0xaa7   :  { %v2100_v34 = vmul.f32 0.03125, %v2096_v33 }
 0xaa8   :  { %v2103_v35 = vsub.f32 %v2093_v26, %v2101_v32  ;;  %v2158_v26 = vrot.slane %v5562_v25, %v57_v18 }
 0xaa9   :  { %v2102_v36 = vsub.f32 %v2092_v30, %v2100_v34  ;;  %v2243_v34 = vrot.slane %v5562_v25, %v143_v16 }
 0xaaa   :  { %v2105_v37 = vmul.f32 %v2103_v35, %v2103_v35 }
 0xaab   :  { %v2104_v17 = vmul.f32 %v2102_v36, %v2102_v36 }
 0xaac   :  { %v2109_v38 = vsel %vm59_vm0, %v2105_v37, 0.0 }
 0xaad   :  { %2110 = vadd.xlane.f32.xlu0 %v2109_v38  ;;  %v2106_v39 = vsel %vm59_vm0, %v2104_v17, 0.0 }
 0xaae   :  { %2107 = vadd.xlane.f32.xlu1 %v2106_v39 }
 0xb3a   :  { %v2111_v58 = vpop.xlane.xlu0 %2110 }
 0xb3b   :  { %v2113_v59 = vmul.f32 0.03125, %v2111_v58  ;;  %v2108_v60 = vpop.xlane.xlu1 %2107 }
 0xb3c   :  { %v2112_v61 = vmul.f32 0.03125, %v2108_v60 }
 0xb3d   :  { %v2115_v62 = vadd.f32 1e-05, %v2113_v59  ;;  %v5094_v59 = vld [vmem:[%s5839_s1 + $0x8] sm:$0xff] }
 0xb3e   :  { %v2114_v63 = vadd.f32 1e-05, %v2112_v61  ;;  %v5095_v61 = vld [vmem:[%s5839_s1] sm:$0xff] }
 0xb3f   :  { %5049 = vrsqrt.f32 %v2115_v62 }
 0xb40   :  { %5051 = vrsqrt.f32 %v2114_v63 }
 0xb49   :  { %v5050_v4 = vpop.eup %5049 }
 0xb4a   :  { %v5052_v6 = vpop.eup %5051  ;;  %v2119_v7 = vmul.f32 %v5050_v4, %v2103_v35 }
 0xb4b   :  { %v2118_v8 = vmul.f32 %v5052_v6, %v2102_v36 }
 0xb4c   :  { %v2125_v10 = vmul.f32 %v2123_v3, %v2119_v7 }
 0xb4d   :  { %v2124_v12 = vmul.f32 %v2123_v3, %v2118_v8 }
 0xb4e   :  { %v5545_v23 = vadd.f32 %v4386_v9, %v2125_v10 }
 0xb4f   :  { %v5543_v22 = vadd.f32 %v4386_v9, %v2124_v12 }
 0xb51   :  { %4723 = vmatprep.mubr.msk.f32.mxu1 %vm59_vm0, %v5543_v22  ;;  %4745 = vmatprep.mubr.msk.f32.mxu0 %vm59_vm0, %v5543_v22 }
 0xb52   :  { %4724 = vmatmul.mubr.msk.f32.vlgmr.msra.gmra.mrb[16].mxu1 %vm59_vm0, %v5545_v23  ;;  %4746 = vmatmul.mubr.msk.f32.vlgmr.msra.gmra.mrb[12].mxu0 %vm59_vm0, %v5545_v23 }
 0xb53   :  { %4931 = vmatpush3.bf16.msra.mxu1 %v4928_v57  ;;  %4734 = vmatprep.mubr.msk.f32.mxu1 %vm59_vm0, %v5543_v22 }
 0xb54   :  { %4933 = vmatprep.subr.bf16.mxu1 %v4932_v24 }
 0xb57   :  { %4935 = vmatpush3.bf16.msra.mxu1 %v4932_v24 }
 0xb5a   :  { %4735 = vmatmul.mubr.msk.f32.vlgmr.msra.gmra.mrb[18].mxu1 %vm59_vm0, %v5545_v23 }
 0xc25   :  { %v4725_v30 = vpop.f32.mrb[16].mxu1  ;;  %v5567_v31 = vpop.f32.mrb[12].mxu0 }
 0xc26   :  { %v2237_v13 = vadd.f32 %v4725_v30, %v2158_v26  ;;  %v2231_v5 = vpop.f32.mrb[17].mxu1  ;;  %v5569_v32 = vpop.f32.mrb[13].mxu0 }
 0xc27   :  { %v2232_v33 = vadd.f32 %v2231_v5, %v2158_v26 }
 0xc28   :  { %2402 = vrot.lane.b32.xlu1 %v2237_v13, %s5121_s27 }
 0xc29   :  { %4750 = vmatprep.mubr.msk.f32.mxu1 %vm481_vm1, %v2232_v33 }
 0xc2d   :  { %v4736_v35 = vpop.f32.mrb[18].mxu1 }
 0xc2e   :  { %v2316_v36 = vadd.f32 %v4736_v35, %v2243_v34  ;;  %v2310_v37 = vpop.f32.mrb[19].mxu1 }
 0xc2f   :  { %v2311_v18 = vadd.f32 %v2310_v37, %v2243_v34 }
 0xc30   :  { %2428 = vrot.lane.b32.xlu1 %v2316_v36, %s5122_s28  ;;  %2416 = vrot.lane.b32.xlu0 %v2316_v36, %s5121_s27 }
 0xc34   :  { %2414 = vrot.lane.b32.xlu1 %v2311_v18, %s5121_s27  ;;  %2400 = vrot.lane.b32.xlu0 %v2232_v33, %s5121_s27 }
 0xc38   :  { %2420 = vrot.lane.b32.xlu1 %v2311_v18, %s5120_s0  ;;  %2422 = vrot.lane.b32.xlu0 %v2316_v36, %s5120_s0 }
 0xc3c   :  { %2426 = vrot.lane.b32.xlu1 %v2311_v18, %s5122_s28  ;;  %2404 = vrot.lane.b32.xlu0 %v2232_v33, %s5120_s0 }
 0xc40   :  { %2408 = vrot.lane.b32.xlu1 %v2232_v33, %s5122_s28  ;;  %2406 = vrot.lane.b32.xlu0 %v2237_v13, %s5120_s0 }
 0xc44   :  { %2410 = vrot.lane.b32.xlu1 %v2237_v13, %s5122_s28 }
 0xc5e   :  { %2452 = vxpose.xlu0.b32.start [1/2] (short) (narrow) %v2311_v18, 8 }
 0xc62   :  { %2453 = vxpose.xlu0.b32.end [2/2] (short) (narrow) %v2316_v36, 8 }
 0xc9a   :  { %v2403_v16 = vpop.permute.xlu1 %2402 }
 0xca2   :  { %v2429_v17 = vpop.permute.xlu1 %2428  ;;  %v2417_v38 = vpop.permute.xlu0 %2416 }
 0xca6   :  { %v2415_v39 = vpop.permute.xlu1 %2414  ;;  %v2401_v40 = vpop.permute.xlu0 %2400 }
 0xca7   :  { %2484 = vxpose.xlu1.b32.start [1/2] (short) (narrow) %v2415_v39, 8  ;;  %v2322_v39 = vrot.slane %v5562_v25, %v222_v29 }
 0xcaa   :  { %v2421_v41 = vpop.permute.xlu1 %2420  ;;  %v2423_v42 = vpop.permute.xlu0 %2422 }
 0xcab   :  { %2485 = vxpose.xlu1.b32.end [2/2] (short) (narrow) %v2417_v38, 8  ;;  %2516 = vxpose.xlu0.b32.start [1/2] (short) (narrow) %v2421_v41, 8  ;;  %v5623_v41 = vadd.f32 %v5567_v31, %v2322_v39 }
 0xcae   :  { %v2405_v44 = vpop.permute.xlu0 %2404  ;;  %v2427_v45 = vpop.permute.xlu1 %2426 }
 0xcaf   :  { %2517 = vxpose.xlu0.b32.end [2/2] (short) (narrow) %v2423_v42, 8  ;;  %4760 = vmatprep.mubr.msk.f32.mxu0 %vm481_vm1, %v2405_v44 }
 0xcb2   :  { %v2407_v46 = vpop.permute.xlu0 %2406  ;;  %v2409_v48 = vpop.permute.xlu1 %2408 }
 0xcb3   :  { %2548 = vxpose.xlu0.b32.start [1/2] (short) (narrow) %v2427_v45, 8 }
 0xcb6   :  { %v2411_v49 = vpop.permute.xlu1 %2410 }
 0xcb7   :  { %2549 = vxpose.xlu0.b32.end [2/2] (short) (narrow) %v2429_v17, 8 }
 0xcde   :  { %v2468_v47 = vpop.trf.xlu0 }
 0xcdf   :  { %4748 = vmatprep.subr.mxu1 %v2468_v47 }
 0xce0   :  { %4749 = vmatpush3.msra.mxu1 %v2468_v47 }
 0xce1   :  { %4751 = vmatmul.mubr.msk.f32.vlgmr.msra.gmra.mrb[20].mxu1 %vm481_vm1, %v2237_v13 }
 0xce2   :  { %4755 = vmatprep.mubr.msk.f32.mxu1 %vm481_vm1, %v2401_v40  ;;  %v5618_v40 = vadd.f32 %v5569_v32, %v2322_v39 }
 0xd27   :  { %v2500_v50 = vpop.trf.xlu1 }
 0xd28   :  { %4753 = vmatprep.subr.mxu1 %v2500_v50 }
 0xd29   :  { %4754 = vmatpush3.msra.mxu1 %v2500_v50 }
 0xd2a   :  { %4756 = vmatmul.mubr.msk.f32.vlgmr.msra.gmra.mrb[22].mxu1 %vm481_vm1, %v2403_v16 }
 0xd2b   :  { %v2532_v51 = vpop.trf.xlu0  ;;  %4765 = vmatprep.mubr.msk.f32.mxu1 %vm481_vm1, %v2409_v48 }
 0xd2c   :  { %4758 = vmatprep.subr.mxu0 %v2532_v51 }
 0xd2d   :  { %4759 = vmatpush3.msra.mxu0 %v2532_v51 }
 0xd2e   :  { %4761 = vmatmul.mubr.msk.f32.vlgmr.msra.gmra.mrb[14].mxu0 %vm481_vm1, %v2407_v46  ;;  %4944 = vmatprep.subr.bf16.mxu0 %v5123_v43 }
 0xd2f   :  { %4772 = vmatprep.mubr.msk.f32.mxu0 %vm5124_vm3, %v5125_v11 }
 0xd33   :  { %v2564_v52 = vpop.trf.xlu0 }
 0xd34   :  { %4763 = vmatprep.subr.mxu1 %v2564_v52 }
 0xd35   :  { %4764 = vmatpush3.msra.mxu1 %v2564_v52 }
 0xd36   :  { %4766 = vmatmul.mubr.msk.f32.vlgmr.msra.gmra.mrb[24].mxu1 %vm481_vm1, %v2411_v49  ;;  %4948 = vmatprep.subr.bf16.mxu1 %v5123_v43 }
 0xd37   :  { %4779 = vmatprep.mubr.msk.f32.mxu1 %vm5124_vm3, %v5125_v11 }
 0xdb4   :  { %v4752_v55 = vpop.f32.mrb[20].mxu1 }
 0xdb5   :  { %v2897_v56 = vmul.f32 0.35355338, %v4752_v55  ;;  %v2650_v57 = vpop.f32.mrb[21].mxu1 }
 0xdb6   :  { %v2896_v58 = vmul.f32 0.35355338, %v2650_v57 }
 0xdb7   :  { %v2905_v60 = vadd.f32 %v5094_v59, %v2897_v56 }
 0xdb8   :  { %v2904_v62 = vadd.f32 %v5095_v61, %v2896_v58 }
 0xdb9   :  { %v2915_v63 = vsel %vm814_vm2, %v2905_v60, -inf }
 0xdba   :  { %2916 = vmax.xlane.f32.xlu0 %v2915_v63  ;;  %v2912_v1 = vsel %vm814_vm2, %v2904_v62, -inf }
 0xdbb   :  { %2913 = vmax.xlane.f32.xlu1 %v2912_v1 }
 0xdfd   :  { %v4757_v3 = vpop.f32.mrb[22].mxu1 }
 0xdfe   :  { %v2899_v4 = vmul.f32 0.35355338, %v4757_v3  ;;  %v2729_v6 = vpop.f32.mrb[23].mxu1 }
 0xdff   :  { %v2898_v7 = vmul.f32 0.35355338, %v2729_v6 }
 0xe00   :  { %v2907_v8 = vadd.f32 %v5094_v59, %v2899_v4 }
 0xe01   :  { %v4762_v9 = vpop.f32.mrb[14].mxu0  ;;  %v2906_v21 = vadd.f32 %v5095_v61, %v2898_v7 }
 0xe02   :  { %v2901_v10 = vmul.f32 0.35355338, %v4762_v9  ;;  %v2808_v12 = vpop.f32.mrb[15].mxu0  ;;  %v2921_v14 = vsel %vm814_vm2, %v2907_v8, -inf }
 0xe03   :  { %v2900_v24 = vmul.f32 0.35355338, %v2808_v12  ;;  %2922 = vmax.xlane.f32.xlu1 %v2921_v14  ;;  %v2918_v13 = vsel %vm814_vm2, %v2906_v21, -inf }
 0xe04   :  { %v2909_v26 = vadd.f32 %v5094_v59, %v2901_v10 }
 0xe05   :  { %v2908_v5 = vadd.f32 %v5095_v61, %v2900_v24 }
 0xe06   :  { %v2927_v30 = vsel %vm814_vm2, %v2909_v26, -inf }
 0xe07   :  { %2928 = vmax.xlane.f32.xlu0 %v2927_v30  ;;  %2919 = vmax.xlane.f32.xlu1 %v2918_v13  ;;  %v2924_v36 = vsel %vm814_vm2, %v2908_v5, -inf }
 0xe09   :  { %v4767_v33 = vpop.f32.mrb[24].mxu1 }
 0xe0a   :  { %v2903_v34 = vmul.f32 0.35355338, %v4767_v33  ;;  %v2887_v35 = vpop.f32.mrb[25].mxu1 }
 0xe0b   :  { %v2902_v37 = vmul.f32 0.35355338, %v2887_v35  ;;  %2925 = vmax.xlane.f32.xlu1 %v2924_v36 }
 0xe0c   :  { %v2911_v18 = vadd.f32 %v5094_v59, %v2903_v34 }
 0xe0d   :  { %v2910_v16 = vadd.f32 %v5095_v61, %v2902_v37 }
 0xe0e   :  { %v2933_v17 = vsel %vm814_vm2, %v2911_v18, -inf }
 0xe0f   :  { %2934 = vmax.xlane.f32.xlu0 %v2933_v17  ;;  %v2930_v38 = vsel %vm814_vm2, %v2910_v16, -inf }
 0xe10   :  { %2931 = vmax.xlane.f32.xlu1 %v2930_v38 }
 0xe21   :  { %2434 = vrot.lane.b32.xlu1 %v5618_v40, %s5121_s27 }
 0xe25   :  { %2440 = vrot.lane.b32.xlu0 %v5618_v40, %s5120_s0  ;;  %2436 = vrot.lane.b32.xlu1 %v5623_v41, %s5121_s27 }
 0xe29   :  { %2446 = vrot.lane.b32.xlu1 %v5618_v40, %s5122_s28 }
 0xe2d   :  { %2442 = vrot.lane.b32.xlu1 %v5623_v41, %s5120_s0 }
 0xe47   :  { %v2917_v29 = vpop.xlane.xlu0 %2916 }
 0xe48   :  { %v2937_v32 = vsub.f32 %v2905_v60, %v2917_v29  ;;  %v2914_v42 = vpop.xlane.xlu1 %2913 }
 0xe49   :  { %v2936_v44 = vsub.f32 %v2904_v62, %v2914_v42 }
 0xe4a   :  { %v2946_v45 = vmul.f32 1.442695, %v2937_v32 }
 0xe4b   :  { %v2944_v46 = vmul.f32 1.442695, %v2936_v44 }
 0xe4c   :  { %5053 = vpow2.f32 %v2946_v45 }
 0xe4d   :  { %5055 = vpow2.f32 %v2944_v46 }
 0xe56   :  { %v5633_v31 = vpop.eup %5053 }
 0xe57   :  { %v2963_v47 = vsel %vm814_vm2, %v5633_v31, 0.0  ;;  %v5637_v48 = vpop.eup %5055 }
 0xe58   :  { %2964 = vadd.xlane.f32.xlu0 %v2963_v47  ;;  %v2960_v49 = vsel %vm814_vm2, %v5637_v48, 0.0 }
 0xe5c   :  { %2961 = vadd.xlane.f32.xlu0 %v2960_v49 }
 0xe90   :  { %v2923_v50 = vpop.xlane.xlu1 %2922 }
 0xe91   :  { %v2939_v51 = vsub.f32 %v2907_v8, %v2923_v50 }
 0xe93   :  { %v2950_v52 = vmul.f32 1.442695, %v2939_v51 }
 0xe94   :  { %v2929_v55 = vpop.xlane.xlu0 %2928  ;;  %v2920_v56 = vpop.xlane.xlu1 %2919 }
 0xe95   :  { %5057 = vpow2.f32 %v2950_v52  ;;  %v2941_v57 = vsub.f32 %v2909_v26, %v2929_v55  ;;  %v2938_v58 = vsub.f32 %v2906_v21, %v2920_v56 }
 0xe97   :  { %v2954_v59 = vmul.f32 1.442695, %v2941_v57  ;;  %v2948_v60 = vmul.f32 1.442695, %v2938_v58 }
 0xe98   :  { %v2926_v61 = vpop.xlane.xlu1 %2925 }
 0xe99   :  { %5059 = vpow2.f32 %v2954_v59  ;;  %v2940_v62 = vsub.f32 %v2908_v5, %v2926_v61 }
 0xe9a   :  { %5061 = vpow2.f32 %v2948_v60 }
 0xe9b   :  { %v2952_v63 = vmul.f32 1.442695, %v2940_v62 }
 0xe9c   :  { %v2935_v1 = vpop.xlane.xlu0 %2934 }
 0xe9d   :  { %5063 = vpow2.f32 %v2952_v63  ;;  %v2943_v3 = vsub.f32 %v2911_v18, %v2935_v1  ;;  %v2932_v4 = vpop.xlane.xlu1 %2931 }
 0xe9e   :  { %v2942_v6 = vsub.f32 %v2910_v16, %v2932_v4 }
 0xe9f   :  { %v5058_v7 = vpop.eup %5057  ;;  %v2958_v8 = vmul.f32 1.442695, %v2943_v3 }
 0xea0   :  { %v2956_v9 = vmul.f32 1.442695, %v2942_v6  ;;  %v2969_v10 = vsel %vm814_vm2, %v5058_v7, 0.0  ;;  %v2441_v37 = vpop.permute.xlu0 %2440 }
 0xea1   :  { %5065 = vpow2.f32 %v2958_v8  ;;  %2970 = vadd.xlane.f32.xlu0 %v2969_v10  ;;  %v2435_v35 = vpop.permute.xlu1 %2434 }
 0xea2   :  { %5067 = vpow2.f32 %v2956_v9 }
 0xea3   :  { %v5642_v12 = vpop.eup %5059 }
 0xea4   :  { %v2975_v14 = vsel %vm814_vm2, %v5642_v12, 0.0  ;;  %v5062_v21 = vpop.eup %5061 }
 0xea5   :  { %2976 = vadd.xlane.f32.xlu0 %v2975_v14  ;;  %v2966_v26 = vsel %vm814_vm2, %v5062_v21, 0.0  ;;  %v2437_v36 = vpop.permute.xlu1 %2436 }
 0xea7   :  { %v5646_v24 = vpop.eup %5063 }
 0xea8   :  { %v2972_v30 = vsel %vm814_vm2, %v5646_v24, 0.0 }
 0xea9   :  { %2967 = vadd.xlane.f32.xlu0 %v2966_v26  ;;  %2973 = vadd.xlane.f32.xlu1 %v2972_v30  ;;  %v2447_v18 = vpop.permute.xlu1 %2446 }
 0xeab   :  { %v5066_v13 = vpop.eup %5065 }
 0xeac   :  { %v2981_v5 = vsel %vm814_vm2, %v5066_v13, 0.0  ;;  %v5068_v33 = vpop.eup %5067 }
 0xead   :  { %2982 = vadd.xlane.f32.xlu1 %v2981_v5  ;;  %v2978_v34 = vsel %vm814_vm2, %v5068_v33, 0.0  ;;  %v2443_v17 = vpop.permute.xlu1 %2442 }
 0xeb1   :  { %2979 = vadd.xlane.f32.xlu1 %v2978_v34 }
 0xebf   :  { %2448 = vrot.lane.b32.xlu0 %v5623_v41, %s5122_s28 }
 0xedd   :  { %3032 = vxpose.xlu0.b32.start [1/2] (short) (narrow) %v2435_v35, 8 }
 0xee1   :  { %3033 = vxpose.xlu0.b32.end [2/2] (short) (narrow) %v2437_v36, 8 }
 0xee4   :  { %3000 = vxpose.xlu1.b32.start [1/2] (short) (narrow) %v5618_v40, 8 }
 0xee5   :  { %v2965_v16 = vpop.xlane.xlu0 %2964  ;;  %3064 = vxpose.xlu0.b32.start [1/2] (short) (narrow) %v2441_v37, 8 }
 0xee6   :  { %5069 = vrcp.f32 %v2965_v16 }
 0xee8   :  { %3001 = vxpose.xlu1.b32.end [2/2] (short) (narrow) %v5623_v41, 8 }
 0xee9   :  { %v2962_v38 = vpop.xlane.xlu0 %2961  ;;  %3065 = vxpose.xlu0.b32.end [2/2] (short) (narrow) %v2443_v17, 8 }
 0xeea   :  { %5071 = vrcp.f32 %v2962_v38 }
 0xeec   :  { %3096 = vxpose.xlu1.b32.start [1/2] (short) (narrow) %v2447_v18, 8 }
 0xef0   :  { %v5070_v39 = vpop.eup %5069 }
 0xef1   :  { %v2993_v32 = vmul.f32 %v5070_v39, %v5633_v31 }
 0xef4   :  { %v5072_v29 = vpop.eup %5071 }
 0xef5   :  { %v2992_v42 = vmul.f32 %v5072_v29, %v5637_v48 }
 0xef7   :  { %v4945_v44 = vpack.c.bf16 %v2993_v32, %v2992_v42 }
 0xef9   :  { %4947 = vmatpush3.bf16.xpose.msk.msra.mxu0 %vm5340_vm4, %v4945_v44 }
 0xefa   :  { %4952 = vmatprep.subr.bf16.mxu0 %v5123_v43 }
 0xf2e   :  { %v2971_v40 = vpop.xlane.xlu0 %2970 }
 0xf2f   :  { %5073 = vrcp.f32 %v2971_v40 }
 0xf32   :  { %v2977_v45 = vpop.xlane.xlu0 %2976 }
 0xf36   :  { %v2968_v41 = vpop.xlane.xlu0 %2967  ;;  %v2974_v47 = vpop.xlane.xlu1 %2973 }
 0xf37   :  { %5075 = vrcp.f32 %v2968_v41 }
 0xf39   :  { %v5074_v49 = vpop.eup %5073 }
 0xf3a   :  { %v2449_v46 = vpop.permute.xlu0 %2448  ;;  %v2995_v51 = vmul.f32 %v5074_v49, %v5058_v7  ;;  %v2983_v52 = vpop.xlane.xlu1 %2982 }
 0xf3b   :  { %3097 = vxpose.xlu1.b32.end [2/2] (short) (narrow) %v2449_v46, 8 }
 0xf3e   :  { %v2980_v55 = vpop.xlane.xlu1 %2979 }
 0xf3f   :  { %5077 = vrcp.f32 %v2980_v55 }
 0xf40   :  { %5079 = vrcp.f32 %v2983_v52 }
 0xf41   :  { %v5076_v50 = vpop.eup %5075  ;;  %5081 = vrcp.f32 %v2974_v47 }
 0xf42   :  { %v2994_v31 = vmul.f32 %v5076_v50, %v5062_v21  ;;  %5083 = vrcp.f32 %v2977_v45 }
 0xf44   :  { %v4949_v48 = vpack.c.bf16 %v2995_v51, %v2994_v31 }
 0xf46   :  { %4951 = vmatpush3.bf16.xpose.msk.msra.mxu1 %vm5340_vm4, %v4949_v48 }
 0xf47   :  { %4956 = vmatprep.subr.bf16.mxu1 %v5123_v43 }
 0xf49   :  { %v5078_v56 = vpop.eup %5077 }
 0xf4a   :  { %v5080_v57 = vpop.eup %5079  ;;  %v2998_v58 = vmul.f32 %v5078_v56, %v5068_v33 }
 0xf4b   :  { %v2999_v59 = vmul.f32 %v5080_v57, %v5066_v13  ;;  %v5082_v60 = vpop.eup %5081 }
 0xf4c   :  { %v5084_v63 = vpop.eup %5083  ;;  %v2996_v43 = vmul.f32 %v5082_v60, %v5646_v24 }
 0xf4d   :  { %v4957_v62 = vpack.c.bf16 %v2999_v59, %v2998_v58  ;;  %v2997_v1 = vmul.f32 %v5084_v63, %v5642_v12 }
 0xf4f   :  { %v4953_v4 = vpack.c.bf16 %v2997_v1, %v2996_v43 }
 0xf5d   :  { %v3048_v61 = vpop.trf.xlu0 }
 0xf5e   :  { %4780 = vmatmul.mubr.msk.f32.vlgmr.msra.gmra.mrb[26].mxu1 %vm814_vm2, %v3048_v61 }
 0xf5f   :  { %4959 = vmatpush3.bf16.xpose.msk.msra.mxu1 %vm5340_vm4, %v4957_v62  ;;  %4793 = vmatprep.mubr.msk.f32.mxu1 %vm5124_vm3, %v5125_v11 }
 0xf64   :  { %v3016_v3 = vpop.trf.xlu1 }
 0xf65   :  { %4773 = vmatmul.mubr.msk.f32.vlgmr.msra.gmra.mrb[16].mxu0 %vm814_vm2, %v3016_v3  ;;  %v3080_v6 = vpop.trf.xlu0 }
 0xf66   :  { %4955 = vmatpush3.bf16.xpose.msk.msra.mxu0 %vm5340_vm4, %v4953_v4  ;;  %4786 = vmatprep.mubr.msk.f32.mxu0 %vm5124_vm3, %v5125_v11 }
 0xf6d   :  { %4787 = vmatmul.mubr.msk.f32.vlgmr.msra.gmra.mrb[18].mxu0 %vm814_vm2, %v3080_v6 }
 0xfb7   :  { %v3112_v7 = vpop.trf.xlu1 }
 0xfb8   :  { %4794 = vmatmul.mubr.msk.f32.vlgmr.msra.gmra.mrb[28].mxu1 %vm814_vm2, %v3112_v7 }
0x1031   :  { %v3282_v8 = vpop.f32.mrb[26].mxu1 }
0x1032   :  { %3476 = vxpose.xlu1.b32.start.end [1/1] (short) (narrow) %v3282_v8, 16  ;;  %v4781_v9 = vpop.f32.mrb[27].mxu1 }
0x1038   :  { %v3203_v10 = vpop.f32.mrb[16].mxu0 }
0x1039   :  { %3444 = vxpose.xlu0.b32.start.end [1/1] (short) (narrow) %v3203_v10, 16  ;;  %v4774_v12 = vpop.f32.mrb[17].mxu0 }
0x1040   :  { %v3361_v14 = vpop.f32.mrb[18].mxu0 }
0x1041   :  { %3508 = vxpose.xlu0.b32.start.end [1/1] (short) (narrow) %v3361_v14, 16  ;;  %v4788_v21 = vpop.f32.mrb[19].mxu0 }
0x108b   :  { %v3440_v28 = vpop.f32.mrb[28].mxu1 }
0x108c   :  { %3540 = vxpose.xlu1.b32.start.end [1/1] (short) (narrow) %v3440_v28, 16  ;;  %v4795_v24 = vpop.f32.mrb[29].mxu1 }
0x10b2   :  { %v3492_v11 = vpop.trf.xlu1 }
0x10b6   :  { %v3493_v13 = vpop.trf.xlu1 }
0x10b9   :  { %v3460_v26 = vpop.trf.xlu0 }
0x10bd   :  { %v3461_v30 = vpop.trf.xlu0 }
0x10c1   :  { %v3524_v5 = vpop.trf.xlu0 }
0x10c2   :  { %v3572_v33 = vcombine.low %v3460_v26, %v3524_v5  ;;  %v3573_v34 = vcombine.high %v3460_v26, %v3524_v5 }
0x10c4   :  { %v3580_v16 = vrot.slane %v3572_v33, %v5366_v20  ;;  %v3587_v17 = vrot.slane %v3573_v34, %v5366_v20 }
0x10c5   :  { %v3525_v36 = vpop.trf.xlu0 }
0x10c6   :  { %v3640_v29 = vcombine.low %v3461_v30, %v3525_v36  ;;  %v3641_v32 = vcombine.high %v3461_v30, %v3525_v36 }
0x10c8   :  { %v3648_v52 = vrot.slane %v3640_v29, %v5366_v20  ;;  %v3655_v48 = vrot.slane %v3641_v32, %v5366_v20 }
0x110c   :  { %v3556_v35 = vpop.trf.xlu1 }
0x110d   :  { %v3588_v37 = vcombine.low %v3492_v11, %v3556_v35  ;;  %v3589_v18 = vcombine.high %v3492_v11, %v3556_v35  ;;  %v4399_v35 = vld [vmem:[%s5840_s2 + $0xe0] sm:$0xff] }
0x110f   :  { %v3596_v38 = vrot.slane %v3588_v37, %v5366_v20  ;;  %v3603_v39 = vrot.slane %v3589_v18, %v5366_v20 }
0x1110   :  { %v3557_v42 = vpop.trf.xlu1 }
0x1111   :  { %v3604_v44 = vcombine.low %v3580_v16, %v3596_v38  ;;  %v3605_v40 = vcombine.high %v3580_v16, %v3596_v38  ;;  %v3620_v45 = vcombine.low %v3587_v17, %v3603_v39  ;;  %v3621_v41 = vcombine.high %v3587_v17, %v3603_v39  ;;  %v4400_v17 = vld [vmem:[%s5840_s2 + $0xe8] sm:$0xff]  ;;  %v4401_v38 = vld [vmem:[%s5840_s2 + $0xf0] sm:$0xff]  ;;  %v4402_v39 = vld [vmem:[%s5840_s2 + $0xf8] sm:$0xff] }
0x1112   :  { %v3656_v46 = vcombine.low %v3493_v13, %v3557_v42  ;;  %v3657_v47 = vcombine.high %v3493_v13, %v3557_v42 }
0x1113   :  { %v3612_v49 = vrot.slane %v3604_v44, %v5369_v27  ;;  %v3619_v50 = vrot.slane %v3605_v40, %v5369_v27  ;;  %v3628_v51 = vrot.slane %v3620_v45, %v5369_v27  ;;  %v3635_v31 = vrot.slane %v3621_v41, %v5369_v27 }
0x1114   :  { %v3664_v55 = vrot.slane %v3656_v46, %v5366_v20  ;;  %v3671_v56 = vrot.slane %v3657_v47, %v5366_v20  ;;  %v4964_v46 = vpack.c.bf16 %v4402_v39, %v4401_v38  ;;  %v4446_v38 = vld [vmem:[%s5844_s6 + $0x48] sm:$0xff]  ;;  %v4447_v39 = vld [vmem:[%s5844_s6 + $0x50] sm:$0xff] }
0x1115   :  { %v3708_v57 = vcombine.low %v3612_v49, %v3619_v50  ;;  %v4431_v58 = vcombine.high %v3612_v49, %v3619_v50  ;;  %v3724_v59 = vcombine.low %v3628_v51, %v3635_v31  ;;  %v4432_v60 = vcombine.high %v3628_v51, %v3635_v31 }
0x1116   :  { %v3672_v61 = vcombine.low %v3648_v52, %v3664_v55  ;;  %v3673_v62 = vcombine.high %v3648_v52, %v3664_v55  ;;  %v3688_v63 = vcombine.low %v3655_v48, %v3671_v56  ;;  %v3689_v43 = vcombine.high %v3655_v48, %v3671_v56 }
0x1117   :  { %v3715_v1 = vrot.slane %v3708_v57, %v5366_v20  ;;  %v3723_v3 = vrot.slane %v4431_v58, %v5366_v20  ;;  %v3731_v4 = vrot.slane %v3724_v59, %v5366_v20  ;;  %v3739_v6 = vrot.slane %v4432_v60, %v5366_v20 }
0x1118   :  { %v3680_v7 = vrot.slane %v3672_v61, %v5369_v27  ;;  %v3687_v8 = vrot.slane %v3673_v62, %v5369_v27  ;;  %v3696_v9 = vrot.slane %v3688_v63, %v5369_v27  ;;  %v3703_v10 = vrot.slane %v3689_v43, %v5369_v27 }
0x1119   :  { %v3741_v12 = vcombine.high %v3715_v1, %v3723_v3  ;;  %v3757_v14 = vcombine.high %v3731_v4, %v3739_v6  ;;  %v3740_v21 = vcombine.low %v3715_v1, %v3723_v3  ;;  %v3756_v28 = vcombine.low %v3731_v4, %v3739_v6 }
0x111a   :  { %v3776_v24 = vcombine.low %v3680_v7, %v3687_v8  ;;  %v4433_v26 = vcombine.high %v3680_v7, %v3687_v8  ;;  %v3792_v11 = vcombine.low %v3696_v9, %v3703_v10  ;;  %v4434_v30 = vcombine.high %v3696_v9, %v3703_v10 }
0x111b   :  { %v3755_v13 = vrot.slane %v3741_v12, %v5369_v27  ;;  %v3771_v5 = vrot.slane %v3757_v14, %v5369_v27  ;;  %v3748_v33 = vrot.slane %v3740_v21, %v5369_v27  ;;  %v3764_v34 = vrot.slane %v3756_v28, %v5369_v27 }
0x111c   :  { %v3783_v36 = vrot.slane %v3776_v24, %v5366_v20  ;;  %v3791_v37 = vrot.slane %v4433_v26, %v5366_v20  ;;  %v3799_v18 = vrot.slane %v3792_v11, %v5366_v20  ;;  %v3807_v16 = vrot.slane %v4434_v30, %v5366_v20 }
0x111d   :  { %v3774_v29 = vcombine.low %v3755_v13, %v3771_v5  ;;  %v3773_v32 = vcombine.high %v3748_v33, %v3764_v34  ;;  %v3772_v42 = vcombine.low %v3748_v33, %v3764_v34  ;;  %v4960_v20 = vpack.c.bf16 %v4400_v17, %v4399_v35  ;;  %v4438_v35 = vld [vmem:[%s5842_s4 + $0x28] sm:$0xff]  ;;  %v4445_v17 = vld [vmem:[%s5844_s6 + $0x40] sm:$0xff] }
0x111e   :  { %v3808_v44 = vcombine.low %v3783_v36, %v3791_v37  ;;  %v3824_v40 = vcombine.low %v3799_v18, %v3807_v16  ;;  %v3809_v45 = vcombine.high %v3783_v36, %v3791_v37  ;;  %v3825_v41 = vcombine.high %v3799_v18, %v3807_v16  ;;  %v4439_v37 = vld [vmem:[%s5842_s4 + $0x30] sm:$0xff]  ;;  %v4440_v18 = vld [vmem:[%s5842_s4 + $0x38] sm:$0xff] }
0x111f   :  { %3854 = vrot.lane.b32.xlu1 %v3774_v29, %s5128_s29  ;;  %3846 = vrot.lane.b32.xlu0 %v3773_v32, %s5129_s30  ;;  %v3775_v50 = vcombine.high %v3755_v13, %v3771_v5  ;;  %v3877_v6 = vrot.slane %v5562_v25, %v1780_v2  ;;  %v4972_v16 = vpack.c.bf16 %v4440_v18, %v4439_v37  ;;  %v4448_v32 = vld [vmem:[%s5844_s6 + $0x58] sm:$0xff] }
0x1120   :  { %v3816_v47 = vrot.slane %v3808_v44, %v5369_v27  ;;  %v3832_v49 = vrot.slane %v3824_v40, %v5369_v27  ;;  %4961 = vmatprep.subr.bf16.mxu0 %v4960_v20  ;;  %v3823_v31 = vrot.slane %v3809_v45, %v5369_v27  ;;  %v3839_v52 = vrot.slane %v3825_v41, %v5369_v27  ;;  %v4449_v44 = vld [vmem:[%s5844_s6 + $0x60] sm:$0xff]  ;;  %v4450_v40 = vld [vmem:[%s5844_s6 + $0x68] sm:$0xff]  ;;  %v4232_v37 = vld [vmem:[%s5845_s7 + $0x18] sm:$0xff] }
0x1121   :  { %4963 = vmatpush3.bf16.msra.mxu0 %v4960_v20  ;;  %v4976_v29 = vpack.c.bf16 %v4446_v38, %v4445_v17  ;;  %v4984_v45 = vpack.c.bf16 %v4450_v40, %v4449_v44 }
0x1122   :  { %v3841_v51 = vcombine.high %v3816_v47, %v3832_v49  ;;  %v3840_v48 = vcombine.low %v3816_v47, %v3832_v49  ;;  %4965 = vmatprep.subr.bf16.mxu0 %v4964_v46  ;;  %v3842_v55 = vcombine.low %v3823_v31, %v3839_v52  ;;  %v3843_v56 = vcombine.high %v3823_v31, %v3839_v52 }
0x1123   :  { %3862 = vrot.lane.b32.xlu0 %v3775_v50, %s5130_s9 }
0x1124   :  { %3848 = vrot.lane.b32.xlu1 %v3841_v51, %s5129_s30  ;;  %v3990_v51 = vrot.slane %v5562_v25, %v1894_v53  ;;  %v4451_v53 = vld [vmem:[%s5844_s6 + $0x70] sm:$0xff] }
0x1125   :  { %4967 = vmatpush3.bf16.msra.mxu0 %v4964_v46 }
0x1126   :  { %4977 = vmatprep.subr.bf16.mxu0 %v4976_v29 }
0x1128   :  { %3856 = vrot.lane.b32.xlu1 %v3842_v55, %s5128_s29 }
0x112c   :  { %3864 = vrot.lane.b32.xlu1 %v3843_v56, %s5130_s9 }
0x1191   :  { %v3847_v57 = vpop.permute.xlu0 %3846  ;;  %v3855_v58 = vpop.permute.xlu1 %3854 }
0x1192   :  { %v3868_v59 = vsel %vm481_vm1, %v3772_v42, %v3847_v57  ;;  %v4980_v42 = vpack.c.bf16 %v4448_v32, %v4447_v39 }
0x1193   :  { %v3870_v27 = vsel %vm814_vm2, %v3868_v59, %v3855_v58 }
0x1195   :  { %v3863_v60 = vpop.permute.xlu0 %3862 }
0x1196   :  { %v3872_v61 = vsel %vm1775_vm5, %v3870_v27, %v3863_v60  ;;  %v3849_v62 = vpop.permute.xlu1 %3848  ;;  %v4452_v60 = vld [vmem:[%s5844_s6 + $0x78] sm:$0xff] }
0x1197   :  { %4804 = vmatprep.mubr.msk.f32.mxu0 %vm59_vm0, %v3872_v61  ;;  %v3869_v43 = vsel %vm481_vm1, %v3840_v48, %v3849_v62  ;;  %v3996_v48 = vrot.slane %v5562_v25, %v1900_v54  ;;  %v4988_v61 = vpack.c.bf16 %v4452_v60, %v4451_v53  ;;  %v4442_v54 = vld [vmem:[%s5843_s5 + $0x1] ss:$0 sm:$0xff] }
0x119a   :  { %v3857_v63 = vpop.permute.xlu1 %3856 }
0x119b   :  { %v3871_v1 = vsel %vm814_vm2, %v3869_v43, %v3857_v63 }
0x119e   :  { %v3865_v3 = vpop.permute.xlu1 %3864 }
0x119f   :  { %v3873_v4 = vsel %vm1775_vm5, %v3871_v1, %v3865_v3 }
0x11a0   :  { %4805 = vmatmul.mubr.msk.f32.vlgmr.msra.gmra.mrb[20].mxu0 %vm59_vm0, %v3873_v4 }
0x11a1   :  { %4979 = vmatpush3.bf16.msra.mxu0 %v4976_v29 }
0x11a2   :  { %4981 = vmatprep.subr.bf16.mxu0 %v4980_v42 }
0x11a5   :  { %4983 = vmatpush3.bf16.msra.mxu0 %v4980_v42  ;;  %v4220_v42 = vrot.slane %v5562_v25, %v2122_v0 }
0x11a6   :  { %4985 = vmatprep.subr.bf16.mxu0 %v4984_v45 }
0x11a9   :  { %4987 = vmatpush3.bf16.msra.mxu0 %v4984_v45 }
0x11aa   :  { %4989 = vmatprep.subr.bf16.mxu0 %v4988_v61 }
0x11ad   :  { %4991 = vmatpush3.bf16.msra.mxu0 %v4988_v61 }
0x1273   :  { %v4806_v7 = vpop.f32.mrb[20].mxu0 }
0x1274   :  { %v3956_v8 = vadd.f32 %v4806_v7, %v3877_v6  ;;  %v3950_v9 = vpop.f32.mrb[21].mxu0 }
0x1275   :  { %v3951_v10 = vadd.f32 %v3950_v9, %v3877_v6  ;;  %v4107_v6 = vrot.slane %v5562_v25, %v2008_v19 }
0x1276   :  { %v3960_v12 = vadd.f32 %v3956_v8, %v5545_v23 }
0x1277   :  { %v3959_v14 = vadd.f32 %v3951_v10, %v5543_v22  ;;  %v4437_v22 = vld [vmem:[%s5842_s4 + $0x20] sm:$0xff] }
0x1278   :  { %v3964_v21 = vsel %vm59_vm0, %v3960_v12, 0.0  ;;  %v4968_v36 = vpack.c.bf16 %v4438_v35, %v4437_v22  ;;  %v4230_v22 = vld [vmem:[%s5845_s7 + $0x8] sm:$0xff] }
0x1279   :  { %3965 = vadd.xlane.f32.xlu1 %v3964_v21  ;;  %v3961_v28 = vsel %vm59_vm0, %v3959_v14, 0.0 }
0x127a   :  { %3962 = vadd.xlane.f32.xlu0 %v3961_v28  ;;  %4969 = vmatprep.subr.bf16.mxu1 %v4968_v36 }
0x127b   :  { %4971 = vmatpush3.bf16.msra.mxu1 %v4968_v36  ;;  %v4231_v36 = vld [vmem:[%s5845_s7 + $0x10] sm:$0xff] }
0x127c   :  { %4973 = vmatprep.subr.bf16.mxu1 %v4972_v16  ;;  %v4996_v18 = vpack.c.bf16 %v4232_v37, %v4231_v36 }
0x127f   :  { %4975 = vmatpush3.bf16.msra.mxu1 %v4972_v16 }
0x1306   :  { %v3966_v24 = vpop.xlane.xlu1 %3965 }
0x1307   :  { %v3968_v26 = vmul.f32 0.03125, %v3966_v24  ;;  %v3963_v11 = vpop.xlane.xlu0 %3962 }
0x1308   :  { %v3967_v30 = vmul.f32 0.03125, %v3963_v11 }
0x1309   :  { %v3970_v13 = vsub.f32 %v3960_v12, %v3968_v26 }
0x130a   :  { %v3969_v2 = vsub.f32 %v3959_v14, %v3967_v30 }
0x130b   :  { %v3972_v34 = vmul.f32 %v3970_v13, %v3970_v13 }
0x130c   :  { %v3971_v5 = vmul.f32 %v3969_v2, %v3969_v2 }
0x130d   :  { %v3976_v23 = vsel %vm59_vm0, %v3972_v34, 0.0 }
0x130e   :  { %v3973_v33 = vsel %vm59_vm0, %v3971_v5, 0.0 }
0x130f   :  { %3974 = vadd.xlane.f32.xlu0 %v3973_v33 }
0x1313   :  { %3977 = vadd.xlane.f32.xlu0 %v3976_v23  ;;  %v4229_v23 = vld [vmem:[%s5845_s7] sm:$0xff] }
0x1314   :  { %v4992_v35 = vpack.c.bf16 %v4230_v22, %v4229_v23 }
0x1316   :  { %4993 = vmatprep.subr.bf16.mxu1 %v4992_v35 }
0x139c   :  { %v3975_v41 = vpop.xlane.xlu0 %3974 }
0x139d   :  { %v3979_v20 = vmul.f32 0.03125, %v3975_v41 }
0x139f   :  { %v3981_v46 = vadd.f32 1e-05, %v3979_v20  ;;  %v4455_v20 = vld [vmem:[%s5841_s3 + $0x18] ss:$0 sm:$0xff]  ;;  %s5096_s3 = scalar_lea.vmem %s4327_s15, 256 }
0x13a0   :  { %v3978_v47 = vpop.xlane.xlu0 %3977  ;;  %p5097_p0 = scmp.ne.s32.totalorder %s4327_s15, %s5096_s3  ;;  %p5102_p2 = scmp.lt.s32.totalorder %s5096_s3, %s5096_s3 }
0x13a1   :  { %5085 = vrsqrt.f32 %v3981_v46  ;;  %v3980_v49 = vmul.f32 0.03125, %v3978_v47 }
0x13a2   :  { %p5103_p3 = por %p5102_p2, %p5101_p1 }
0x13a3   :  { %v3982_v50 = vadd.f32 1e-05, %v3980_v49 }
0x13a4   :  { %p5104_p4 = pnand %p5103_p3, %p5097_p0 }
0x13a5   :  { %5087 = vrsqrt.f32 %v3982_v50 }
0x13ab   :  { %v5086_v31 = vpop.eup %5085 }
0x13ac   :  { %v3985_v52 = vmul.f32 %v5086_v31, %v3969_v2 }
0x13ae   :  { %v3991_v55 = vmul.f32 %v3990_v51, %v3985_v52 }
0x13af   :  { %v5088_v56 = vpop.eup %5087 }
0x13b0   :  { %v3986_v57 = vmul.f32 %v5088_v56, %v3970_v13  ;;  %v3997_v58 = vadd.f32 %v3996_v48, %v3991_v55 }
0x13b2   :  { %v3992_v59 = vmul.f32 %v3990_v51, %v3986_v57  ;;  %4815 = vmatprep.mubr.msk.f32.mxu1 %vm59_vm0, %v3997_v58 }
0x13b4   :  { %v3998_v27 = vadd.f32 %v3996_v48, %v3992_v59 }
0x13b6   :  { %4816 = vmatmul.mubr.msk.f32.vlgmr.msra.gmra.mrb[30].mxu1 %vm59_vm0, %v3998_v27 }
0x13b7   :  { %4995 = vmatpush3.bf16.msra.mxu1 %v4992_v35 }
0x13b8   :  { %4997 = vmatprep.subr.bf16.mxu1 %v4996_v18 }
0x13bb   :  { %4999 = vmatpush3.bf16.msra.mxu1 %v4996_v18 }
0x1489   :  { %v4817_v62 = vpop.f32.mrb[30].mxu1 }
0x148a   :  { %v4090_v63 = vadd.f32 %v4817_v62, %v4442_v54  ;;  %v4084_v43 = vpop.f32.mrb[31].mxu1 }
0x148b   :  { %v4085_v1 = vadd.f32 %v4442_v54, %v4084_v43 }
0x148c   :  { %v4094_v4 = vmax.f32 %v4090_v63, 0.0 }
0x148d   :  { %v4093_v3 = vmax.f32 %v4085_v1, 0.0 }
0x148f   :  { %4834 = vmatprep.mubr.msk.f32.mxu0 %vm2010_vm6, %v4093_v3 }
0x1490   :  { %4835 = vmatmul.mubr.msk.f32.vlgmr.msra.gmra.mrb[22].mxu0 %vm2010_vm6, %v4094_v4 }
0x1563   :  { %v4836_v7 = vpop.f32.mrb[22].mxu0 }
0x1564   :  { %v4186_v8 = vadd.f32 %v4836_v7, %v4107_v6  ;;  %v4180_v9 = vpop.f32.mrb[23].mxu0 }
0x1565   :  { %v4181_v10 = vadd.f32 %v4180_v9, %v4107_v6 }
0x1566   :  { %v4190_v12 = vadd.f32 %v4186_v8, %v3998_v27 }
0x1567   :  { %v4189_v14 = vadd.f32 %v4181_v10, %v3997_v58 }
0x1568   :  { %v4194_v21 = vsel %vm59_vm0, %v4190_v12, 0.0 }
0x1569   :  { %4195 = vadd.xlane.f32.xlu0 %v4194_v21  ;;  %v4191_v28 = vsel %vm59_vm0, %v4189_v14, 0.0 }
0x156a   :  { %4192 = vadd.xlane.f32.xlu1 %v4191_v28 }
0x15f6   :  { %v4196_v24 = vpop.xlane.xlu0 %4195 }
0x15f7   :  { %v4198_v26 = vmul.f32 0.03125, %v4196_v24  ;;  %v4193_v11 = vpop.xlane.xlu1 %4192 }
0x15f8   :  { %v4197_v30 = vmul.f32 0.03125, %v4193_v11 }
0x15f9   :  { %v4200_v13 = vsub.f32 %v4190_v12, %v4198_v26 }
0x15fa   :  { %v4199_v2 = vsub.f32 %v4189_v14, %v4197_v30 }
0x15fb   :  { %v4202_v5 = vmul.f32 %v4200_v13, %v4200_v13 }
0x15fc   :  { %v4201_v19 = vmul.f32 %v4199_v2, %v4199_v2 }
0x15fd   :  { %v4206_v33 = vsel %vm59_vm0, %v4202_v5, 0.0 }
0x15fe   :  { %4207 = vadd.xlane.f32.xlu0 %v4206_v33  ;;  %v4203_v34 = vsel %vm59_vm0, %v4201_v19, 0.0 }
0x15ff   :  { %4204 = vadd.xlane.f32.xlu1 %v4203_v34 }
0x168b   :  { %v4208_v16 = vpop.xlane.xlu0 %4207 }
0x168c   :  { %v4210_v17 = vmul.f32 0.03125, %v4208_v16  ;;  %v4205_v38 = vpop.xlane.xlu1 %4204 }
0x168d   :  { %v4209_v39 = vmul.f32 0.03125, %v4205_v38 }
0x168e   :  { %v4212_v29 = vadd.f32 1e-05, %v4210_v17 }
0x168f   :  { %v4211_v32 = vadd.f32 1e-05, %v4209_v39 }
0x1690   :  { %5089 = vrsqrt.f32 %v4212_v29 }
0x1691   :  { %5091 = vrsqrt.f32 %v4211_v32 }
0x169a   :  { %v5090_v44 = vpop.eup %5089 }
0x169b   :  { %v5092_v40 = vpop.eup %5091  ;;  %v4216_v45 = vmul.f32 %v5090_v44, %v4200_v13 }
0x169c   :  { %v4215_v41 = vmul.f32 %v5092_v40, %v4199_v2 }
0x169d   :  { %v4222_v46 = vmul.f32 %v4220_v42, %v4216_v45 }
0x169e   :  { %v4221_v47 = vmul.f32 %v4220_v42, %v4215_v41 }
0x169f   :  { %v4228_v50 = vadd.f32 %v4455_v20, %v4222_v46 }
0x16a0   :  { %v4227_v49 = vadd.f32 %v4455_v20, %v4221_v47 }
0x16a2   :  { %4845 = vmatprep.mubr.msk.f32.mxu1 %vm59_vm0, %v4227_v49 }
0x16a3   :  { %4846 = vmatmul.mubr.msk.f32.vlgmr.msra.gmra.mrb[32].mxu1 %vm59_vm0, %v4228_v50 }
0x1776   :  { %v4847_v0 = vpop.f32.mrb[32].mxu1 }
0x1777   :  { %v4316_v25 = vadd.f32 %v4847_v0, %v4456_v15  ;;  %v4310_v51 = vpop.f32.mrb[33].mxu1 }
0x1778   :  { %v4311_v31 = vadd.f32 %v4456_v15, %v4310_v51 }
0x1779   :  { %4320 = vst [vmem:[#allocation2 + $0x8] sm:$0xff] %v4316_v25 }
0x177a   :  { %4319 = vst [vmem:[#allocation2] sm:$0xff] %v4311_v31 }
0x177b   :  { %5107 = shalt.err (!%p5104_p4)
}
0x177c   :  { %s5108_s7 = scalar_lea.hbm %s5846_s8, 256 }
0x177d   :  { %p5109_p5 = scmp.ne.s32.totalorder %s5846_s8, %s5108_s7  ;;  %p5112_p6 = scmp.lt.u32.totalorder %s5108_s7, %s5846_s8 }
0x177f   :  { %p5114_p7 = pnand %p5112_p6, %p5109_p5 }
0x1781   :  { %5117 = shalt.err (!%p5114_p7)
}
0x1782   :  { %s5132_s27 = smov 128  }
0x1783   :  { %4332 = dma.vmem_to_hbm [thread:$0]  %s4327_s15, 256, %s5846_s8, [#allocation3], %s5132_s27, %s5132_s27, %s5129_s30  }
0x1784   :  { %5118 = dma.done.wait [#allocation3], 256  }
0x1785   :  { %5119 = vsyncadd [#allocation3], 4294967040 }
0x1786   :  { %4336 = vsyncpa [#allocation3], 1 }

</bundles_post_ra>
